<compile_context>
chip_gen: v7x
topology: tpu7x:2x2x1
jax: 0.10.0
libtpu: 0.0.40
codegen_flags: <defaults>
</compile_context>

<pallas_src>
import jax
import jax.numpy as jnp
from jax import lax
from jax.experimental import pallas as pl
from jax.experimental.pallas import tpu as pltpu

LN_EPS = 1e-5  # FusedLayerNorm / nn.LayerNorm default


def _round_up(n, m):
    return ((n + m - 1) // m) * m


def _probe_single_buffer():
    """One-time probe: does this JAX accept pipeline_mode=pl.Buffered(1)?"""
    try:
        pl.BlockSpec((8, 128), lambda i: (0, 0), pipeline_mode=pl.Buffered(1))
        return True
    except (TypeError, AttributeError):
        return False


_SINGLE_BUFFER_OK = _probe_single_buffer()


def _default_vmem_limit():
    """~80% of physical per-core VMEM; safe fallback if the query fails."""
    try:
        return int(pltpu.get_tpu_info().vmem_capacity_bytes * 0.8)
    except Exception:
        # 48 MiB: fits v7x's 64 MiB/TC with headroom; conservative on v5e/v6e.
        return 48 * 1024 * 1024


def _pick_tm(M, Dff):
    """Row tile: big enough to amortize per-step overhead, small enough to
    bound the f32 (tm, Dff) intermediate, and >=2 grid steps for megacore."""
    tm_cap = 128 if Dff >= 2048 else 256      # bound tm*Dff*4B spill footprint
    Mp8 = _round_up(max(M, 1), 8)
    tm = min(tm_cap, Mp8)
    # Ensure >= 2 grid steps so ("parallel",) shards rows across 2 TCs (v7x).
    if Mp8 > 8 and (Mp8 + tm - 1) // tm < 2:
        tm = max(8, _round_up((Mp8 + 1) // 2, 8))
    return tm


def _layernorm(x, gamma, beta):
    """Two-pass LayerNorm (mean, then centered variance): still only two
    cross-lane reductions, but no E[x^2]-E[x]^2 cancellation."""
    mu = jnp.mean(x, axis=-1, keepdims=True)
    xc = x - mu
    var = jnp.mean(xc * xc, axis=-1, keepdims=True)
    return xc * lax.rsqrt(var + LN_EPS) * gamma + beta


def _mish(x, approx_recip):
    # PyTorch Mish: x * tanh(softplus(x)), softplus threshold = 20.
    # tanh(log(w)) == (w^2 - 1) / (w^2 + 1) with w = 1 + exp(x):
    # one EUP exp + one (optionally approx, EUP) reciprocal.
    w = 1.0 + jnp.exp(jnp.minimum(x, 20.0))
    w2 = w * w
    denom = w2 + 1.0
    inv = pl.reciprocal(denom, approx=True) if approx_recip else 1.0 / denom
    t = (w2 - 1.0) * inv
    return jnp.where(x > 20.0, x, x * t)


def _make_kernel(approx_recip):
    def ffn2_kernel(x_ref, g1_ref, b1_ref, w1_ref, bb1_ref,
                    g2_ref, b2_ref, w2_ref, bb2_ref, o_ref):
        # Streamed tile arrives in native dtype; all LN / bias / Mish math f32.
        x = x_ref[...].astype(jnp.float32)

        # LayerNorm(dim_in)
        xn = _layernorm(x, g1_ref[...], b1_ref[...])

        # Linear(dim_in -> dim_feedforward): operands in weight dtype, f32 acc.
        h = jnp.dot(xn.astype(w1_ref.dtype), w1_ref[...],
                    preferred_element_type=jnp.float32) + bb1_ref[...]

        # Dropout (identity in eval) -> Mish
        h = _mish(h, approx_recip)

        # LayerNorm(dim_feedforward)
        hn = _layernorm(h, g2_ref[...], b2_ref[...])

        # Linear(dim_feedforward -> dim_in); Dropout identity
        out = jnp.dot(hn.astype(w2_ref.dtype), w2_ref[...],
                      preferred_element_type=jnp.float32) + bb2_ref[...]

        o_ref[...] = out.astype(o_ref.dtype)

    return ffn2_kernel


def prepare_params(params, *, weight_dtype=jnp.bfloat16):
    """One-time parameter prep (cast + reshape). Reuse the result across calls
    so the per-call wrapper does zero HBM round-trips on the weights."""
    D, Dff = params["w1"].shape
    return {
        "g1": params["ln1_gamma"].reshape(1, D).astype(jnp.float32),
        "b1": params["ln1_beta"].reshape(1, D).astype(jnp.float32),
        "w1": params["w1"].astype(weight_dtype),
        "bb1": params["b1"].reshape(1, Dff).astype(jnp.float32),
        "g2": params["ln2_gamma"].reshape(1, Dff).astype(jnp.float32),
        "b2": params["ln2_beta"].reshape(1, Dff).astype(jnp.float32),
        "w2": params["w2"].astype(weight_dtype),
        "bb2": params["b2"].reshape(1, D).astype(jnp.float32),
    }


def feed_forward2(x, prepared, *, precise=False, tm=None,
                  vmem_limit_bytes=None, row_buffer_count=2):
    """x: (B, S, dim_in) in any float dtype.  prepared: prepare_params(...)."""
    B, S, D = x.shape
    Dw, Dff = prepared["w1"].shape
    assert Dw == D, "prepared params do not match x feature dim"
    # Lane-dense feature axes keep every store unmasked and MXU tiles full.
    assert D % 128 == 0 and Dff % 128 == 0, (
        "dim_in / dim_feedforward must be multiples of 128")
    # TODO(synk): support non-multiple-of-128 feature dims by zero-padding
    # features + params on the wrapper side (exact with the two-pass LN stats).

    M = B * S
    if tm is None:
        tm = _pick_tm(M, Dff)
    assert tm % 8 == 0, "row tile must be a multiple of 8"

    Mp = _round_up(M, tm)
    x2d = x.reshape(M, D)              # native dtype: no wrapper-side upcast
    if Mp != M:
        # TODO(synk): replace with a masked final store / clamped Element
        # index_map to avoid this HBM copy for misaligned M.
        x2d = jnp.pad(x2d, ((0, Mp - M), (0, 0)))

    if vmem_limit_bytes is None:
        vmem_limit_bytes = _default_vmem_limit()

    grid = (Mp // tm,)
    args = (x2d, prepared["g1"], prepared["b1"], prepared["w1"], prepared["bb1"],
            prepared["g2"], prepared["b2"], prepared["w2"], prepared["bb2"])
    kernel = _make_kernel(approx_recip=not precise)

    def run(single_buffer_params):
        def row_spec():
            if row_buffer_count != 2 and _SINGLE_BUFFER_OK:
                return pl.BlockSpec((tm, D), lambda i: (i, 0),
                                    pipeline_mode=pl.Buffered(row_buffer_count))
            return pl.BlockSpec((tm, D), lambda i: (i, 0))

        if single_buffer_params:
            # Constant-index blocks are fetched once; one buffer halves their
            # VMEM footprint (matters most on v7x's 64 MiB/TC).
            def const(shape):
                return pl.BlockSpec(shape, lambda i: (0, 0),
                                    pipeline_mode=pl.Buffered(1))
        else:
            def const(shape):
                return pl.BlockSpec(shape, lambda i: (0, 0))

        return pl.pallas_call(
            kernel,
            out_shape=jax.ShapeDtypeStruct((Mp, D), x.dtype),
            grid_spec=pltpu.PrefetchScalarGridSpec(
                num_scalar_prefetch=0,
                grid=grid,
                in_specs=[
                    row_spec(),                          # x tile (streamed)
                    const((1, D)), const((1, D)),        # ln1 gamma/beta
                    const((D, Dff)), const((1, Dff)),    # w1, b1
                    const((1, Dff)), const((1, Dff)),    # ln2 gamma/beta
                    const((Dff, D)), const((1, D)),      # w2, b2
                ],
                out_specs=row_spec(),
            ),
            compiler_params=pltpu.CompilerParams(
                dimension_semantics=("parallel",),
                vmem_limit_bytes=vmem_limit_bytes,
            ),
        )(*args)

    if _SINGLE_BUFFER_OK:
        try:
            out = run(single_buffer_params=True)
        except (TypeError, NotImplementedError, pltpu.LoweringException):
            # Narrow fallback: only feature-support failures.  Genuine VMEM /
            # numerical errors propagate (the double-buffered variant uses
            # strictly more VMEM, so an OOM would not be silently hidden).
            out = run(single_buffer_params=False)
    else:
        out = run(single_buffer_params=False)

    return out[:M].reshape(B, S, D)


def init_params(key, dim_in, dim_ff):
    k1, k2, k3, k4 = jax.random.split(key, 4)
    # nn.Linear stores weight as (out, in); we keep the transposed (in, out)
    # layout so the kernel does x @ W directly.
    bound1 = 1.0 / (dim_in ** 0.5)
    bound2 = 1.0 / (dim_ff ** 0.5)
    return {
        "ln1_gamma": jnp.ones((dim_in,), jnp.float32),
        "ln1_beta": jnp.zeros((dim_in,), jnp.float32),
        "w1": jax.random.uniform(k1, (dim_in, dim_ff), jnp.float32, -bound1, bound1),
        "b1": jax.random.uniform(k2, (dim_ff,), jnp.float32, -bound1, bound1),
        "ln2_gamma": jnp.ones((dim_ff,), jnp.float32),
        "ln2_beta": jnp.zeros((dim_ff,), jnp.float32),
        "w2": jax.random.uniform(k3, (dim_ff, dim_in), jnp.float32, -bound2, bound2),
        "b2": jax.random.uniform(k4, (dim_in,), jnp.float32, -bound2, bound2),
    }


def reference(x, p):
    """Pure-JAX f32 reference of the same forward pass (PyTorch semantics)."""
    def ln(v, g, b):
        mu = jnp.mean(v, -1, keepdims=True)
        var = jnp.mean((v - mu) ** 2, -1, keepdims=True)
        return (v - mu) / jnp.sqrt(var + LN_EPS) * g + b

    def mish(v):
        sp = jnp.where(v > 20.0, v, jnp.log1p(jnp.exp(jnp.minimum(v, 20.0))))
        return v * jnp.tanh(sp)

    h = ln(x, p["ln1_gamma"], p["ln1_beta"]) @ p["w1"] + p["b1"]
    h = mish(h)
    h = ln(h, p["ln2_gamma"], p["ln2_beta"]) @ p["w2"] + p["b2"]
    return h


if __name__ == "__main__":
    key = jax.random.PRNGKey(0)
    kx, kp = jax.random.split(key)

    B, S, DIM_IN, DIM_FF = 2, 64, 128, 256   # M = 128 tokens -> two 64-row tiles
    x = jax.random.normal(kx, (B, S, DIM_IN), jnp.float32)
    params = init_params(kp, DIM_IN, DIM_FF)

    ref = reference(x, params)

    # 1) Precise path: f32 MXU operands + exact reciprocal in Mish.
    #    Tolerance is tight enough to catch structural bugs; it leaves margin
    #    for possible default-precision differences between the in-kernel and
    #    XLA f32 matmuls.
    prep_f32 = prepare_params(params, weight_dtype=jnp.float32)
    out_exact = jax.block_until_ready(feed_forward2(x, prep_f32, precise=True))
    assert out_exact.shape == (B, S, DIM_IN)
    assert jnp.allclose(out_exact, ref, atol=1e-2, rtol=1e-2), \
        "precise-path mismatch vs reference"

    # 2) Fast path: bf16 MXU operands + approx EUP reciprocal (loose tolerance).
    prep_bf16 = prepare_params(params)   # cast/reshape once, reuse across calls
    out_fast = jax.block_until_ready(feed_forward2(x, prep_bf16))
    assert out_fast.shape == (B, S, DIM_IN)
    assert jnp.allclose(out_fast, ref, atol=5e-2, rtol=5e-2), \
        "fast-path mismatch vs reference"

    print("KERNEL_OK")
</pallas_src>

<mosaic_0001>
module attributes {stable_mosaic.version = 11 : i64} {
  func.func @ffn2_kernel(%arg0: i32, %arg1: memref<64x128xf32, #tpu.memory_space<vmem>>, %arg2: memref<1x128xf32, #tpu.memory_space<vmem>>, %arg3: memref<1x128xf32, #tpu.memory_space<vmem>>, %arg4: memref<128x256xf32, #tpu.memory_space<vmem>>, %arg5: memref<1x256xf32, #tpu.memory_space<vmem>>, %arg6: memref<1x256xf32, #tpu.memory_space<vmem>>, %arg7: memref<1x256xf32, #tpu.memory_space<vmem>>, %arg8: memref<256x128xf32, #tpu.memory_space<vmem>>, %arg9: memref<1x128xf32, #tpu.memory_space<vmem>>, %arg10: memref<64x128xf32, #tpu.memory_space<vmem>>) attributes {dimension_semantics = [#tpu.dimension_semantics<parallel>], iteration_bounds = array<i64: 2>, scalar_prefetch = 0 : i64, scratch_operands = 0 : i64, tpu.core_type = #tpu.core_type<tc>, window_params = [{transform_indices = @transform_0, window_bounds = array<i64: 64, 128>}, {pipeline_mode = #tpu.pipeline_mode<synchronous>, transform_indices = @transform_1, window_bounds = array<i64: 1, 128>}, {pipeline_mode = #tpu.pipeline_mode<synchronous>, transform_indices = @transform_2, window_bounds = array<i64: 1, 128>}, {pipeline_mode = #tpu.pipeline_mode<synchronous>, transform_indices = @transform_3, window_bounds = array<i64: 128, 256>}, {pipeline_mode = #tpu.pipeline_mode<synchronous>, transform_indices = @transform_4, window_bounds = array<i64: 1, 256>}, {pipeline_mode = #tpu.pipeline_mode<synchronous>, transform_indices = @transform_5, window_bounds = array<i64: 1, 256>}, {pipeline_mode = #tpu.pipeline_mode<synchronous>, transform_indices = @transform_6, window_bounds = array<i64: 1, 256>}, {pipeline_mode = #tpu.pipeline_mode<synchronous>, transform_indices = @transform_7, window_bounds = array<i64: 256, 128>}, {pipeline_mode = #tpu.pipeline_mode<synchronous>, transform_indices = @transform_8, window_bounds = array<i64: 1, 128>}, {transform_indices = @transform_9, window_bounds = array<i64: 64, 128>}]} {
    %c0 = arith.constant 0 : index
    %c0_0 = arith.constant 0 : index
    %0 = vector.load %arg1[%c0, %c0_0] : memref<64x128xf32, #tpu.memory_space<vmem>>, vector<64x128xf32>
    %c0_1 = arith.constant 0 : index
    %c0_2 = arith.constant 0 : index
    %1 = vector.load %arg2[%c0_1, %c0_2] : memref<1x128xf32, #tpu.memory_space<vmem>>, vector<1x128xf32>
    %c0_3 = arith.constant 0 : index
    %c0_4 = arith.constant 0 : index
    %2 = vector.load %arg3[%c0_3, %c0_4] : memref<1x128xf32, #tpu.memory_space<vmem>>, vector<1x128xf32>
    %cst = arith.constant dense<0.000000e+00> : vector<64xf32>
    %3 = vector.multi_reduction <add>, %0, %cst [1] : vector<64x128xf32> to vector<64xf32>
    %4 = vector.shape_cast %3 : vector<64xf32> to vector<64x1xf32>
    %cst_5 = arith.constant 1.280000e+02 : f32
    %5 = vector.broadcast %cst_5 : f32 to vector<64x1xf32>
    %6 = arith.divf %4, %5 : vector<64x1xf32>
    %7 = vector.broadcast %6 : vector<64x1xf32> to vector<64x128xf32>
    %8 = arith.subf %0, %7 : vector<64x128xf32>
    %9 = arith.mulf %8, %8 : vector<64x128xf32>
    %cst_6 = arith.constant dense<0.000000e+00> : vector<64xf32>
    %10 = vector.multi_reduction <add>, %9, %cst_6 [1] : vector<64x128xf32> to vector<64xf32>
    %11 = vector.shape_cast %10 : vector<64xf32> to vector<64x1xf32>
    %cst_7 = arith.constant 1.280000e+02 : f32
    %12 = vector.broadcast %cst_7 : f32 to vector<64x1xf32>
    %13 = arith.divf %11, %12 : vector<64x1xf32>
    %cst_8 = arith.constant 9.99999974E-6 : f32
    %14 = vector.broadcast %cst_8 : f32 to vector<64x1xf32>
    %15 = arith.addf %13, %14 : vector<64x1xf32>
    %16 = math.rsqrt %15 : vector<64x1xf32>
    %17 = vector.broadcast %16 : vector<64x1xf32> to vector<64x128xf32>
    %18 = arith.mulf %8, %17 : vector<64x128xf32>
    %19 = vector.broadcast %1 : vector<1x128xf32> to vector<64x128xf32>
    %20 = arith.mulf %18, %19 : vector<64x128xf32>
    %21 = vector.broadcast %2 : vector<1x128xf32> to vector<64x128xf32>
    %22 = arith.addf %20, %21 : vector<64x128xf32>
    %c0_9 = arith.constant 0 : index
    %c0_10 = arith.constant 0 : index
    %23 = vector.load %arg4[%c0_9, %c0_10] : memref<128x256xf32, #tpu.memory_space<vmem>>, vector<128x256xf32>
    %cst_11 = arith.constant dense<0.000000e+00> : vector<64x256xf32>
    %24 = tpu.matmul %22, %23, %cst_11 {dimension_numbers = #tpu.dot_dimension_numbers<[1], [0], [0], [1], [0, 0, 1, 1], [], []>} : vector<64x128xf32>, vector<128x256xf32>, vector<64x256xf32> -> vector<64x256xf32>
    %c0_12 = arith.constant 0 : index
    %c0_13 = arith.constant 0 : index
    %25 = vector.load %arg5[%c0_12, %c0_13] : memref<1x256xf32, #tpu.memory_space<vmem>>, vector<1x256xf32>
    %26 = vector.broadcast %25 : vector<1x256xf32> to vector<64x256xf32>
    %27 = arith.addf %24, %26 : vector<64x256xf32>
    %cst_14 = arith.constant 2.000000e+01 : f32
    %28 = vector.broadcast %cst_14 : f32 to vector<64x256xf32>
    %29 = arith.minimumf %27, %28 : vector<64x256xf32>
    %30 = math.exp %29 : vector<64x256xf32>
    %cst_15 = arith.constant 1.000000e+00 : f32
    %31 = vector.broadcast %cst_15 : f32 to vector<64x256xf32>
    %32 = arith.addf %31, %30 : vector<64x256xf32>
    %33 = arith.mulf %32, %32 : vector<64x256xf32>
    %cst_16 = arith.constant 1.000000e+00 : f32
    %34 = vector.broadcast %cst_16 : f32 to vector<64x256xf32>
    %35 = arith.addf %33, %34 : vector<64x256xf32>
    %cst_17 = arith.constant 1.000000e+00 : f32
    %36 = vector.broadcast %cst_17 : f32 to vector<64x256xf32>
    %37 = arith.divf %36, %35 : vector<64x256xf32>
    %cst_18 = arith.constant 1.000000e+00 : f32
    %38 = vector.broadcast %cst_18 : f32 to vector<64x256xf32>
    %39 = arith.subf %33, %38 : vector<64x256xf32>
    %40 = arith.mulf %39, %37 : vector<64x256xf32>
    %cst_19 = arith.constant 2.000000e+01 : f32
    %41 = vector.broadcast %cst_19 : f32 to vector<64x256xf32>
    %42 = arith.cmpf ogt, %27, %41 : vector<64x256xf32>
    %43 = arith.mulf %27, %40 : vector<64x256xf32>
    %44 = arith.select %42, %27, %43 : vector<64x256xi1>, vector<64x256xf32>
    %c0_20 = arith.constant 0 : index
    %c0_21 = arith.constant 0 : index
    %45 = vector.load %arg6[%c0_20, %c0_21] : memref<1x256xf32, #tpu.memory_space<vmem>>, vector<1x256xf32>
    %c0_22 = arith.constant 0 : index
    %c0_23 = arith.constant 0 : index
    %46 = vector.load %arg7[%c0_22, %c0_23] : memref<1x256xf32, #tpu.memory_space<vmem>>, vector<1x256xf32>
    %cst_24 = arith.constant dense<0.000000e+00> : vector<64xf32>
    %47 = vector.multi_reduction <add>, %44, %cst_24 [1] : vector<64x256xf32> to vector<64xf32>
    %48 = vector.shape_cast %47 : vector<64xf32> to vector<64x1xf32>
    %cst_25 = arith.constant 2.560000e+02 : f32
    %49 = vector.broadcast %cst_25 : f32 to vector<64x1xf32>
    %50 = arith.divf %48, %49 : vector<64x1xf32>
    %51 = vector.broadcast %50 : vector<64x1xf32> to vector<64x256xf32>
    %52 = arith.subf %44, %51 : vector<64x256xf32>
    %53 = arith.mulf %52, %52 : vector<64x256xf32>
    %cst_26 = arith.constant dense<0.000000e+00> : vector<64xf32>
    %54 = vector.multi_reduction <add>, %53, %cst_26 [1] : vector<64x256xf32> to vector<64xf32>
    %55 = vector.shape_cast %54 : vector<64xf32> to vector<64x1xf32>
    %cst_27 = arith.constant 2.560000e+02 : f32
    %56 = vector.broadcast %cst_27 : f32 to vector<64x1xf32>
    %57 = arith.divf %55, %56 : vector<64x1xf32>
    %cst_28 = arith.constant 9.99999974E-6 : f32
    %58 = vector.broadcast %cst_28 : f32 to vector<64x1xf32>
    %59 = arith.addf %57, %58 : vector<64x1xf32>
    %60 = math.rsqrt %59 : vector<64x1xf32>
    %61 = vector.broadcast %60 : vector<64x1xf32> to vector<64x256xf32>
    %62 = arith.mulf %52, %61 : vector<64x256xf32>
    %63 = vector.broadcast %45 : vector<1x256xf32> to vector<64x256xf32>
    %64 = arith.mulf %62, %63 : vector<64x256xf32>
    %65 = vector.broadcast %46 : vector<1x256xf32> to vector<64x256xf32>
    %66 = arith.addf %64, %65 : vector<64x256xf32>
    %c0_29 = arith.constant 0 : index
    %c0_30 = arith.constant 0 : index
    %67 = vector.load %arg8[%c0_29, %c0_30] : memref<256x128xf32, #tpu.memory_space<vmem>>, vector<256x128xf32>
    %cst_31 = arith.constant dense<0.000000e+00> : vector<64x128xf32>
    %68 = tpu.matmul %66, %67, %cst_31 {dimension_numbers = #tpu.dot_dimension_numbers<[1], [0], [0], [1], [0, 0, 1, 1], [], []>} : vector<64x256xf32>, vector<256x128xf32>, vector<64x128xf32> -> vector<64x128xf32>
    %c0_32 = arith.constant 0 : index
    %c0_33 = arith.constant 0 : index
    %69 = vector.load %arg9[%c0_32, %c0_33] : memref<1x128xf32, #tpu.memory_space<vmem>>, vector<1x128xf32>
    %70 = vector.broadcast %69 : vector<1x128xf32> to vector<64x128xf32>
    %71 = arith.addf %68, %70 : vector<64x128xf32>
    %c0_34 = arith.constant 0 : index
    %c0_35 = arith.constant 0 : index
    %72 = vector.load %arg10[%c0_34, %c0_35] : memref<64x128xf32, #tpu.memory_space<vmem>>, vector<64x128xf32>
    tpu.vector_store %arg10[%c0_34, %c0_35], %71 {strides = array<i32>} : memref<64x128xf32, #tpu.memory_space<vmem>>, vector<64x128xf32>,
    return
  }
  func.func @transform_0(%arg0: i32) -> (i32, i32) {
    %c0_i32 = arith.constant 0 : i32
    %c0_i32_0 = arith.constant 0 : i32
    return %arg0, %c0_i32 : i32, i32
  }
  func.func @transform_1(%arg0: i32) -> (i32, i32) {
    %c0_i32 = arith.constant 0 : i32
    %c0_i32_0 = arith.constant 0 : i32
    %c0_i32_1 = arith.constant 0 : i32
    return %c0_i32, %c0_i32_0 : i32, i32
  }
  func.func @transform_2(%arg0: i32) -> (i32, i32) {
    %c0_i32 = arith.constant 0 : i32
    %c0_i32_0 = arith.constant 0 : i32
    %c0_i32_1 = arith.constant 0 : i32
    return %c0_i32, %c0_i32_0 : i32, i32
  }
  func.func @transform_3(%arg0: i32) -> (i32, i32) {
    %c0_i32 = arith.constant 0 : i32
    %c0_i32_0 = arith.constant 0 : i32
    %c0_i32_1 = arith.constant 0 : i32
    return %c0_i32, %c0_i32_0 : i32, i32
  }
  func.func @transform_4(%arg0: i32) -> (i32, i32) {
    %c0_i32 = arith.constant 0 : i32
    %c0_i32_0 = arith.constant 0 : i32
    %c0_i32_1 = arith.constant 0 : i32
    return %c0_i32, %c0_i32_0 : i32, i32
  }
  func.func @transform_5(%arg0: i32) -> (i32, i32) {
    %c0_i32 = arith.constant 0 : i32
    %c0_i32_0 = arith.constant 0 : i32
    %c0_i32_1 = arith.constant 0 : i32
    return %c0_i32, %c0_i32_0 : i32, i32
  }
  func.func @transform_6(%arg0: i32) -> (i32, i32) {
    %c0_i32 = arith.constant 0 : i32
    %c0_i32_0 = arith.constant 0 : i32
    %c0_i32_1 = arith.constant 0 : i32
    return %c0_i32, %c0_i32_0 : i32, i32
  }
  func.func @transform_7(%arg0: i32) -> (i32, i32) {
    %c0_i32 = arith.constant 0 : i32
    %c0_i32_0 = arith.constant 0 : i32
    %c0_i32_1 = arith.constant 0 : i32
    return %c0_i32, %c0_i32_0 : i32, i32
  }
  func.func @transform_8(%arg0: i32) -> (i32, i32) {
    %c0_i32 = arith.constant 0 : i32
    %c0_i32_0 = arith.constant 0 : i32
    %c0_i32_1 = arith.constant 0 : i32
    return %c0_i32, %c0_i32_0 : i32, i32
  }
  func.func @transform_9(%arg0: i32) -> (i32, i32) {
    %c0_i32 = arith.constant 0 : i32
    %c0_i32_0 = arith.constant 0 : i32
    return %arg0, %c0_i32 : i32, i32
  }
}

</mosaic_0001>

<bundles_post_ra>
// kernel: tpu_custom_call.1
= control target key start
LH: loop header
LB: loop body
LE: loop exit
PB: predicated region body
PF: predicated region fallthrough
CT: control target
= control target key end

     0   :  { %s2607_s0 = inlined_call_operand.hbm [shape: f32[128,128], index: 0, kind: input, shape index: {}]   ;;  %s2608_s1 = inlined_call_operand.vmem [shape: f32[1,128], index: 1, kind: input, shape index: {}]   ;;  %s2609_s2 = inlined_call_operand.hbm [shape: f32[1,128], index: 2, kind: input, shape index: {}]   ;;  %s2610_s3 = inlined_call_operand.hbm [shape: f32[128,256], index: 3, kind: input, shape index: {}]   ;;  %s2611_s4 = inlined_call_operand.vmem [shape: f32[1,256], index: 4, kind: input, shape index: {}]   ;;  %s2612_s5 = inlined_call_operand.vmem [shape: f32[1,256], index: 5, kind: input, shape index: {}]   ;;  %s2613_s6 = inlined_call_operand.vmem [shape: f32[1,256], index: 6, kind: input, shape index: {}]   ;;  %s2614_s7 = inlined_call_operand.hbm [shape: f32[256,128], index: 7, kind: input, shape index: {}]   ;;  %s2615_s8 = inlined_call_operand.vmem [shape: f32[1,128], index: 8, kind: input, shape index: {}]   ;;  %s2616_s9 = inlined_call_operand.hbm [shape: f32[128,128], index: 9, kind: output, shape index: {}]  }
   0x1   :  { %2622 = sst [smem:[#allocation16_spill]] %s2609_s2 }
   0x2   :  { %14 = vsyncpa [#allocation3], 0 }
   0x3   :  { %16 = vsyncpa [#allocation3 + $0x1], 0 }
   0x4   :  { %17 = vsyncpa [#allocation6], 0 }
   0x5   :  { %18 = vsyncpa [#allocation9], 0 }
   0x6   :  { %19 = vsyncpa [#allocation4], 0 }
   0x7   :  { %21 = vsyncpa [#allocation4 + $0x1], 0  ;;  %s1933_s30 = smov 0   ;;  %s1935_s10 = smov 0  }
   0x8   :  { %s1937_s11 = smov 0   ;;  %s1939_s12 = smov 0  }
   0x9 LB: > { %s1954_s13 = sadd.s32 4294967295, %s1869_s12   ;;  %s1340_s14 = sadd.s32 4294967294, %s1869_s12   ;;  %s1869_s12 = sphi %s1939_s12, %s2646_s12   ;;  %s1865_s11 = sphi %s1937_s11, %s2645_s11   ;;  %s1861_s10 = sphi %s1935_s10, %s2644_s10   ;;  %s1857_s30 = sphi %s1933_s30, %s2643_s30  }
   0xa   : > { %p47_p0 = scmp.ne.s32.totalorder %s1861_s10, %s1857_s30  ;;  %p2617_p1 = scmp.eq.s32.totalorder %s1954_s13, 0 }
   0xb   : > { %p245_p3 = scmp.eq.s32.totalorder %s1340_s14, 1  ;;  %p1341_p5 = scmp.ge.s32.totalorder %s1869_s12, 1 }
   0xc   : > { %p1963_p4 = por %p2617_p1, %p47_p0  ;;  %p252_p7 = scmp.lt.s32.totalorder %s1869_s12, 3 }
   0xd   : > { %p1968_p6 = por %p245_p3, %p47_p0  ;;  %s1871_s18 = smov [#allocation5]  }
   0xe   : > { %s2623_s15 = scalar_select %p1963_p4, 1, 0 }
   0xf   : > { %s2624_s16 = scalar_select %p1968_p6, 1, 0 }
  0x10   : > { %p1973_p8 = pnand %p1341_p5, %p252_p7  ;;  %s268_s19 = sshll.u32 %s1871_s18, 4  ;;  %s269_s19 = int_to_ptr.vmem [resolvable:$true] %s268_s19 }
  0x11   : > { %2625 = sst [smem:[#allocation15_spill]] %s2624_s16  ;;  %s1872_s20 = smov [#allocation7]  }
  0x12   : > { %s2626_s17 = scalar_select %p1973_p8, 1, 0 }
  0x13   : > { %p1517_p10 = pneg %p1973_p8  ;;  %s278_s21 = sshll.u32 %s1872_s20, 4  ;;  %s1986_s21 = int_to_ptr.vmem [resolvable:$true] %s278_s21 }
  0x14   : > { %s1873_s23 = smov [#allocation8]   ;;  %s2628_s2 = sld [smem:[#allocation16_spill]] }
  0x15   : > { %p1982_p11 = pnand %p1517_p10, %p2617_p1  ;;  %s1988_s24 = sshll.u32 %s1873_s23, 4  ;;  %s301_s24 = int_to_ptr.vmem [resolvable:$true] %s1988_s24 }
  0x17   : > { %p1998_p13 = pneg %p1982_p11 }
  0x1a   : > { %s1681_s27 = scalar_lea.hbm %s2628_s2, 16 }
  0x1b   : > { %p1682_p12 = scmp.ne.s32.totalorder %s2628_s2, %s1681_s27  ;;  %p1688_p5 = scmp.lt.u32.totalorder %s1681_s27, %s2628_s2 }
  0x1d   : > { %p1684_p0 = pnand %p1998_p13, %p1682_p12 }
  0x1f   : > { %p1685_p3 = pneg %p1684_p0 }
  0x21   : > { %p1690_p7 = pnand %p1688_p5, %p1685_p3 }
  0x23   : > { %1693 = shalt.err (!%p1690_p7)
}
  0x24   : > { %s1694_s23 = scalar_lea.vmem %s269_s19, 16  ;;  %s1701_s25 = scalar_lea.vmem %s269_s19, 32 }
  0x25   : > { %p1695_p10 = scmp.ne.s32.totalorder %s269_s19, %s1694_s23  ;;  %p1702_p2 = scmp.lt.s32.totalorder %s269_s19, %s269_s19 }
  0x26   : > { %p1703_p6 = scmp.lt.s32.totalorder %s1701_s25, %s1694_s23 }
  0x27   : > { %p1697_p9 = pnand %p1695_p10, %p1998_p13 }
  0x28   : > { %p1704_p4 = por %p1703_p6, %p1702_p2 }
  0x29   : > { %p1698_p1 = pneg %p1697_p9 }
  0x2b   : > { %p1705_p8 = pnand %p1704_p4, %p1698_p1 }
  0x2d   : > { %1708 = shalt.err (!%p1705_p8)
}
  0x2e   : > { %1520 = dma.hbm_to_vmem [thread:$0]  (!%p1982_p11), %s2628_s2, 16, %s269_s19, [#allocation6]  }
  0x2f   : > { %s1709_s18 = scalar_lea.hbm %s2610_s3, 4096 }
  0x30   : > { %p1710_p9 = scmp.ne.s32.totalorder %s2610_s3, %s1709_s18  ;;  %p1716_p1 = scmp.lt.u32.totalorder %s1709_s18, %s2610_s3 }
  0x32   : > { %p1712_p12 = pnand %p1710_p9, %p1998_p13 }
  0x34   : > { %p1713_p2 = pneg %p1712_p12 }
  0x36   : > { %p1718_p4 = pnand %p1716_p1, %p1713_p2 }
  0x38   : > { %1721 = shalt.err (!%p1718_p4)
}
  0x39   : > { %s1722_s19 = scalar_lea.vmem %s1986_s21, 4096  ;;  %p1730_p3 = scmp.lt.s32.totalorder %s1986_s21, %s1986_s21 }
  0x3a   : > { %p1723_p6 = scmp.ne.s32.totalorder %s1986_s21, %s1722_s19  ;;  %p1731_p5 = scmp.lt.s32.totalorder %s1722_s19, %s1722_s19 }
  0x3c   : > { %p1725_p8 = pnand %p1723_p6, %p1998_p13  ;;  %p1732_p7 = por %p1731_p5, %p1730_p3 }
  0x3e   : > { %p1726_p0 = pneg %p1725_p8 }
  0x40   : > { %p1733_p10 = pnand %p1732_p7, %p1726_p0 }
  0x42   : > { %1736 = shalt.err (!%p1733_p10)
}
  0x43   : > { %s1874_s16 = smov 256   ;;  %s1875_s26 = smov 16  }
  0x44   : > { %1523 = dma.hbm_to_vmem [thread:$0]  (!%p1982_p11), %s2610_s3, 4096, %s1986_s21, [#allocation6], %s1874_s16, %s1874_s16, %s1875_s26  }
  0x45   : > { %s1737_s20 = scalar_lea.hbm %s2614_s7, 4096 }
  0x46   : > { %p1738_p9 = scmp.ne.s32.totalorder %s2614_s7, %s1737_s20  ;;  %p1744_p1 = scmp.lt.u32.totalorder %s1737_s20, %s2614_s7 }
  0x48   : > { %p1740_p12 = pnand %p1738_p9, %p1998_p13 }
  0x4a   : > { %p1741_p2 = pneg %p1740_p12 }
  0x4c   : > { %p1746_p4 = pnand %p1744_p1, %p1741_p2 }
  0x4e   : > { %1749 = shalt.err (!%p1746_p4)
}
  0x4f   : > { %s1750_s28 = scalar_lea.vmem %s301_s24, 4096  ;;  %p1758_p3 = scmp.lt.s32.totalorder %s301_s24, %s301_s24 }
  0x50   : > { %p1751_p6 = scmp.ne.s32.totalorder %s301_s24, %s1750_s28  ;;  %p1759_p5 = scmp.lt.s32.totalorder %s1750_s28, %s1750_s28 }
  0x52   : > { %p1753_p8 = pnand %p1751_p6, %p1998_p13  ;;  %p1760_p7 = por %p1759_p5, %p1758_p3 }
  0x54   : > { %p1754_p0 = pneg %p1753_p8 }
  0x56   : > { %p1761_p10 = pnand %p1760_p7, %p1754_p0 }
  0x58   : > { %1764 = shalt.err (!%p1761_p10)
}
  0x59   : > { %s2621_s21 = smov 128   ;;  %s1877_s2 = smov 8  }
  0x5a   : > { %1526 = dma.hbm_to_vmem [thread:$0]  (!%p1982_p11), %s2614_s7, 4096, %s301_s24, [#allocation9], %s2621_s21, %s2621_s21, %s1877_s2  }
  0x5b   : > { %s2060_s26 = sadd.s32 1, %s1869_s12   ;;  %s34_s29 = sadd.s32 1, %s1865_s11 }
  0x5c   : > { %s31_s27 = ssub.s32 %s1869_s12, %s2060_s26  ;;  %p41_p9 = scmp.ne.s32.totalorder %s1865_s11, %s1861_s10 }
  0x5d   : > { %p32_p13 = scmp.eq.s32.totalorder %s31_s27, 0  ;;  %p42_p12 = scmp.eq.s32.totalorder %s1869_s12, 0 }
  0x5e   : > { %p1538_p2 = scmp.lt.s32.totalorder %s1869_s12, 2  ;;  %p2630_p4 = scmp.eq.s32.totalorder %s1954_s13, 1 }
  0x5f   : > { %s2070_s18 = scalar_select %p32_p13, %s1865_s11, %s34_s29  }
  0x60   : > { %p43_p1 = por %p42_p12, %p41_p9  ;;  %p2074_p6 = por %p2630_p4, %p41_p9 }
  0x61   : > { %s317_s20 = sand.u32 1, %s1865_s11   ;;  %s1379_s23 = sshll.u32 %s1869_s12, 10 }
  0x62   : > { %s1346_s24 = sshll.u32 %s317_s20, 6  ;;  %s2083_s28 = scalar_lea.hbm %s2607_s0, %s1379_s23 }
  0x63   : > { %s321_s14 = scalar_lea.vmem [#allocation2], %s1346_s24  ;;  %p2085_p11 = pnand %p1538_p2, %p43_p1 }
  0x64   : > { %s328_s16 = sshll.u32 %s321_s14, 4  ;;  %s2091_s29 = scalar_lea.sflag [#allocation3], %s317_s20  ;;  %s2089_s16 = int_to_ptr.vmem [resolvable:$true] %s328_s16 }
  0x65   : > { %s1765_s21 = scalar_lea.hbm %s2083_s28, 1024  ;;  %p1767_p0 = pneg %p2085_p11 }
  0x66   : > { %p1766_p8 = scmp.ne.s32.totalorder %s2083_s28, %s1765_s21  ;;  %s1770_s25 = scalar_lea.hbm %s2607_s0, 2048 }
  0x67   : > { %p1771_p7 = scmp.lt.u32.totalorder %s2083_s28, %s2607_s0  ;;  %p1772_p10 = scmp.lt.u32.totalorder %s1770_s25, %s1765_s21 }
  0x68   : > { %p1768_p3 = pnand %p1767_p0, %p1766_p8  ;;  %p1774_p9 = scmp.lt.u32.totalorder %s1765_s21, %s2083_s28 }
  0x69   : > { %p1773_p13 = por %p1772_p10, %p1771_p7 }
  0x6a   : > { %p1769_p5 = pneg %p1768_p3 }
  0x6b   : > { %p1775_p12 = por %p1774_p9, %p1773_p13 }
  0x6d   : > { %p1776_p2 = pnand %p1775_p12, %p1769_p5 }
  0x6f   : > { %1779 = shalt.err (!%p1776_p2)
}
  0x70   : > { %s1780_s20 = scalar_lea.vmem %s2089_s16, 1024  ;;  %s1878_s23 = smov [#allocation2]  }
  0x71   : > { %p1781_p1 = scmp.ne.s32.totalorder %s2089_s16, %s1780_s20  ;;  %s1785_s24 = sshll.u32 %s1878_s23, 4  ;;  %s1786_s24 = int_to_ptr.vmem [resolvable:$false] %s1785_s24 }
  0x72   : > { %s1787_s19 = scalar_lea.vmem %s1786_s24, 2048  ;;  %p1788_p3 = scmp.lt.s32.totalorder %s2089_s16, %s1786_s24 }
  0x73   : > { %p1783_p4 = pnand %p1781_p1, %p1767_p0  ;;  %p1789_p7 = scmp.lt.s32.totalorder %s1787_s19, %s1780_s20 }
  0x75   : > { %p1784_p8 = pneg %p1783_p4  ;;  %p1790_p10 = por %p1789_p7, %p1788_p3 }
  0x77   : > { %p1791_p13 = pnand %p1790_p10, %p1784_p8 }
  0x79   : > { %1794 = shalt.err (!%p1791_p13)
}
  0x7a   : > { %s2633_s21 = smov 128   ;;  %p2634_p0 = scmp.ne.s32.totalorder %s2626_s17, 0 }
  0x7b   : > { %1530 = dma.hbm_to_vmem [thread:$0]  (!%p2085_p11), %s2083_s28, 1024, %s2089_s16, %s2091_s29, %s2633_s21, %s2633_s21, %s1877_s2  }
  0x7c   : > { %340 = sbr.rel (%p2634_p0) target bundleno = 1281 (0x501), region = 56  ;;  %s2125_s25 = sand.u32 (!%p2634_p0), 1, %s1861_s10  }
  0x7d   : > { %s1350_s14 = sshll.u32 (!%p2634_p0), %s2125_s25, 6  ;;  %s343_s20 = scalar_lea.sflag (!%p2634_p0), [#allocation3], %s2125_s25 }
  0x7e   : > { %s346_s27 = scalar_lea.vmem (!%p2634_p0), [#allocation2], %s1350_s14  ;;  %p2635_p5 = scmp.ne.s32.totalorder (!%p2634_p0), %s2623_s15, 0 }
  0x83   : > { %1840 = dma.done.wait (%p2635_p5), %s343_s20, 1024  }
  0x84   : > { %1842 = vsyncadd (%p2635_p5), %s343_s20, 4294966272  ;;  %p2636_p11 = scmp.eq.s32.totalorder %s1954_s13, 0 }
  0x86   : > { %1844 = dma.done.wait (%p2636_p11), [#allocation6], 4112   ;;  %p2637_p9 = pmov %p2636_p11 }
  0x88   : > { %1846 = vsyncadd (%p2637_p9), [#allocation6], 4294963184  ;;  %p2638_p12 = pmov %p2637_p9 }
  0x89   : > { %p2639_p2 = pmov %p2637_p9 }
  0x8a   : > { %1848 = dma.done.wait (%p2638_p12), [#allocation9], 4096  }
  0x8b   : > { %1850 = vsyncadd (%p2639_p2), [#allocation9], 4294963200  ;;  %v395_v0 = vld [vmem:[%s346_s27] sm:$0xff]  ;;  %v397_v1 = vld [vmem:[%s346_s27 + $0x10] sm:$0xff]  ;;  %s2546_s20 = scalar_lea.vmem [#allocation10], %s1350_s14  ;;  %s1225_s28 = scalar_lea.sflag [#allocation4], %s2125_s25 }
  0x8c   : > { %405 = vadd.xlane.f32.xlu0 %v395_v0  ;;  %409 = vadd.xlane.f32.xlu1 %v397_v1  ;;  %v396_v2 = vld [vmem:[%s346_s27 + $0x8] sm:$0xff]  ;;  %v398_v3 = vld [vmem:[%s346_s27 + $0x18] sm:$0xff]  ;;  %v399_v4 = vld [vmem:[%s346_s27 + $0x20] sm:$0xff]  ;;  %s1238_s14 = sshll.u32 %s2546_s20, 4  ;;  %s2556_s14 = int_to_ptr.vmem [resolvable:$true] %s1238_s14 }
  0x8d   : > { %v400_v5 = vld [vmem:[%s346_s27 + $0x28] sm:$0xff]  ;;  %v401_v6 = vld [vmem:[%s346_s27 + $0x30] sm:$0xff]  ;;  %v402_v7 = vld [vmem:[%s346_s27 + $0x38] sm:$0xff]  ;;  %s1380_s27 = sshll.u32 %s1954_s13, 10  ;;  %s1795_s16 = scalar_lea.vmem %s2556_s14, 1024 }
  0x8e   : > { %v523_v8 = vld [vmem:[#allocation7 + $0x8] sm:$0xff]  ;;  %v525_v9 = vld [vmem:[#allocation7 + $0x18] sm:$0xff]  ;;  %v522_v10 = vld [vmem:[#allocation7] sm:$0xff]  ;;  %s2562_s2 = scalar_lea.hbm %s2616_s9, %s1380_s27  ;;  %p1796_p1 = scmp.ne.s32.totalorder %s2556_s14, %s1795_s16 }
  0x8f   : > { %v1437_v11 = vpack.c.bf16 %v525_v9, %v523_v8  ;;  %v524_v12 = vld [vmem:[#allocation7 + $0x10] sm:$0xff]  ;;  %v527_v13 = vld [vmem:[#allocation7 + $0x28] sm:$0xff]  ;;  %v529_v14 = vld [vmem:[#allocation7 + $0x38] sm:$0xff]  ;;  %s1880_s13 = smov [#allocation10]  }
  0x90   : > { %407 = vadd.xlane.f32.xlu0 %v396_v2  ;;  %411 = vadd.xlane.f32.xlu1 %v398_v3  ;;  %v1439_v15 = vpack.c.bf16 %v524_v12, %v522_v10  ;;  %v1441_v16 = vpack.c.bf16 %v529_v14, %v527_v13  ;;  %v526_v17 = vld [vmem:[#allocation7 + $0x20] sm:$0xff]  ;;  %v528_v18 = vld [vmem:[#allocation7 + $0x30] sm:$0xff]  ;;  %v531_v19 = vld [vmem:[#allocation7 + $0x48] sm:$0xff]  ;;  %p1797_p4 = pnand %p1796_p1, %p2074_p6  ;;  %s1799_s29 = sshll.u32 %s1880_s13, 4  ;;  %s1800_s29 = int_to_ptr.vmem [resolvable:$false] %s1799_s29 }
  0x91   : > { %1438 = vmatprep.subr.bf16.mxu0 %v1437_v11  ;;  %v533_v20 = vld [vmem:[#allocation7 + $0x58] sm:$0xff]  ;;  %v1443_v21 = vpack.c.bf16 %v528_v18, %v526_v17  ;;  %v530_v23 = vld [vmem:[#allocation7 + $0x40] sm:$0xff]  ;;  %v532_v24 = vld [vmem:[#allocation7 + $0x50] sm:$0xff]  ;;  %s1801_s23 = scalar_lea.vmem %s1800_s29, 2048  ;;  %p1802_p3 = scmp.lt.s32.totalorder %s2556_s14, %s1800_s29 }
  0x92   : > { %1440 = vmatpush1.bf16.msra.mxu0 %v1439_v15  ;;  %v1445_v22 = vpack.c.bf16 %v533_v20, %v531_v19  ;;  %v1447_v25 = vpack.c.bf16 %v532_v24, %v530_v23  ;;  %v535_v58 = vld [vmem:[#allocation7 + $0x68] sm:$0xff]  ;;  %v537_v59 = vld [vmem:[#allocation7 + $0x78] sm:$0xff]  ;;  %v534_v61 = vld [vmem:[#allocation7 + $0x60] sm:$0xff]  ;;  %v1879_v24 = vmov 0.0   ;;  %p1798_p8 = pneg %p1797_p4  ;;  %p1803_p7 = scmp.lt.s32.totalorder %s1801_s23, %s1795_s16 }
  0x93   : > { %1442 = vmatprep.subr.bf16.mxu0 %v1441_v16  ;;  %v1449_v60 = vpack.c.bf16 %v537_v59, %v535_v58  ;;  %v536_v62 = vld [vmem:[#allocation7 + $0x70] sm:$0xff]  ;;  %v542_v9 = vld [vmem:[#allocation7 + $0xa0] sm:$0xff]  ;;  %v547_v12 = vld [vmem:[#allocation7 + $0xc8] sm:$0xff]  ;;  %630 = vmatprep.mubr.f32.mxu0 %v1879_v24 }
  0x94   : > { %413 = vadd.xlane.f32.xlu0 %v399_v4  ;;  %415 = vadd.xlane.f32.xlu1 %v400_v5  ;;  %v1451_v63 = vpack.c.bf16 %v536_v62, %v534_v61  ;;  %v544_v10 = vld [vmem:[#allocation7 + $0xb0] sm:$0xff]  ;;  %v549_v13 = vld [vmem:[#allocation7 + $0xd8] sm:$0xff]  ;;  %v546_v15 = vld [vmem:[#allocation7 + $0xc0] sm:$0xff]  ;;  %p1804_p10 = por %p1803_p7, %p1802_p3 }
  0x95   : > { %v1459_v11 = vpack.c.bf16 %v544_v10, %v542_v9  ;;  %v1461_v14 = vpack.c.bf16 %v549_v13, %v547_v12  ;;  %v548_v16 = vld [vmem:[#allocation7 + $0xd0] sm:$0xff]  ;;  %v551_v18 = vld [vmem:[#allocation7 + $0xe8] sm:$0xff]  ;;  %v553_v19 = vld [vmem:[#allocation7 + $0xf8] sm:$0xff] }
  0x96   : > { %1444 = vmatpush1.bf16.msra.mxu0 %v1443_v21  ;;  %v1463_v17 = vpack.c.bf16 %v548_v16, %v546_v15  ;;  %v1465_v20 = vpack.c.bf16 %v553_v19, %v551_v18  ;;  %v550_v21 = vld [vmem:[#allocation7 + $0xe0] sm:$0xff]  ;;  %p1805_p13 = pnand %p1804_p10, %p1798_p8 }
  0x97   : > { %1446 = vmatprep.subr.bf16.mxu0 %v1445_v22  ;;  %v552_v22 = vld [vmem:[#allocation7 + $0xf0] sm:$0xff] }
  0x98   : > { %417 = vadd.xlane.f32.xlu0 %v401_v6  ;;  %419 = vadd.xlane.f32.xlu1 %v402_v7  ;;  %v1467_v23 = vpack.c.bf16 %v552_v22, %v550_v21  ;;  %v556_v21 = vlaneseq }
  0x9a   : > { %1448 = vmatpush1.bf16.msra.mxu0 %v1447_v25 }
  0x9b   : > { %1450 = vmatprep.subr.bf16.mxu0 %v1449_v60 }
  0x9e   : > { %1452 = vmatpush1.bf16.msra.mxu0 %v1451_v63 }
 0x119   : > { %v406_v26 = vpop.xlane.xlu0 %405  ;;  %v410_v27 = vpop.xlane.xlu1 %409 }
 0x11a   : > { %v422_v28 = vmul.f32 0.0078125, %v406_v26  ;;  %v424_v29 = vmul.f32 0.0078125, %v410_v27 }
 0x11c   : > { %v2143_v30 = vsub.f32 %v395_v0, %v422_v28  ;;  %v2145_v31 = vsub.f32 %v397_v1, %v424_v29  ;;  %v539_v0 = vld [vmem:[#allocation7 + $0x88] sm:$0xff]  ;;  %v541_v1 = vld [vmem:[#allocation7 + $0x98] sm:$0xff] }
 0x11d   : > { %v408_v32 = vpop.xlane.xlu0 %407  ;;  %v412_v33 = vpop.xlane.xlu1 %411 }
 0x11e   : > { %v423_v34 = vmul.f32 0.0078125, %v408_v32  ;;  %v438_v35 = vmul.f32 %v2143_v30, %v2143_v30  ;;  %v425_v36 = vmul.f32 0.0078125, %v412_v33  ;;  %v440_v39 = vmul.f32 %v2145_v31, %v2145_v31 }
 0x120   : > { %v2149_v37 = vsub.f32 %v396_v2, %v423_v34  ;;  %446 = vadd.xlane.f32.xlu0 %v438_v35  ;;  %v2151_v38 = vsub.f32 %v398_v3, %v425_v36  ;;  %v1453_v2 = vpack.c.bf16 %v541_v1, %v539_v0  ;;  %v538_v3 = vld [vmem:[#allocation7 + $0x80] sm:$0xff] }
 0x121   : > { %v414_v40 = vpop.xlane.xlu0 %413  ;;  %v416_v41 = vpop.xlane.xlu1 %415 }
 0x122   : > { %v426_v42 = vmul.f32 0.0078125, %v414_v40  ;;  %v439_v43 = vmul.f32 %v2149_v37, %v2149_v37  ;;  %v427_v44 = vmul.f32 0.0078125, %v416_v41  ;;  %v441_v47 = vmul.f32 %v2151_v38, %v2151_v38  ;;  %1454 = vmatprep.subr.bf16.mxu0 %v1453_v2 }
 0x124   : > { %v2157_v45 = vsub.f32 %v399_v4, %v426_v42  ;;  %450 = vadd.xlane.f32.xlu0 %v440_v39  ;;  %448 = vadd.xlane.f32.xlu1 %v439_v43  ;;  %v2159_v46 = vsub.f32 %v400_v5, %v427_v44  ;;  %v540_v4 = vld [vmem:[#allocation7 + $0x90] sm:$0xff] }
 0x125   : > { %v418_v48 = vpop.xlane.xlu0 %417  ;;  %v420_v49 = vpop.xlane.xlu1 %419  ;;  %v1455_v5 = vpack.c.bf16 %v540_v4, %v538_v3 }
 0x126   : > { %v428_v50 = vmul.f32 0.0078125, %v418_v48  ;;  %v442_v51 = vmul.f32 %v2157_v45, %v2157_v45  ;;  %v429_v52 = vmul.f32 0.0078125, %v420_v49  ;;  %v443_v55 = vmul.f32 %v2159_v46, %v2159_v46 }
 0x127   : > { %1456 = vmatpush1.bf16.msra.mxu0 %v1455_v5 }
 0x128   : > { %v2165_v53 = vsub.f32 %v401_v6, %v428_v50  ;;  %452 = vadd.xlane.f32.xlu1 %v441_v47  ;;  %454 = vadd.xlane.f32.xlu0 %v442_v51  ;;  %v2167_v54 = vsub.f32 %v402_v7, %v429_v52  ;;  %v543_v6 = vld [vmem:[#allocation7 + $0xa8] sm:$0xff]  ;;  %v545_v7 = vld [vmem:[#allocation7 + $0xb8] sm:$0xff] }
 0x129   : > { %v1457_v8 = vpack.c.bf16 %v545_v7, %v543_v6  ;;  %v1355_v52 = vld [vmem:[%s2608_s1] ss:$0 sm:$0xff] }
 0x12a   : > { %v444_v56 = vmul.f32 %v2165_v53, %v2165_v53  ;;  %v445_v57 = vmul.f32 %v2167_v54, %v2167_v54 }
 0x12b   : > { %1458 = vmatprep.subr.bf16.mxu0 %v1457_v8 }
 0x12c   : > { %456 = vadd.xlane.f32.xlu1 %v443_v55  ;;  %458 = vadd.xlane.f32.xlu0 %v444_v56 }
 0x12d   : > { %1460 = vmatpush1.bf16.msra.mxu0 %v1459_v11 }
 0x12e   : > { %1462 = vmatprep.subr.bf16.mxu0 %v1461_v14 }
 0x130   : > { %460 = vadd.xlane.f32.xlu1 %v445_v57  ;;  %v1356_v57 = vld [vmem:[#allocation5] ss:$0 sm:$0xff] }
 0x131   : > { %1464 = vmatpush1.bf16.msra.mxu0 %v1463_v17 }
 0x132   : > { %1466 = vmatprep.subr.bf16.mxu0 %v1465_v20 }
 0x135   : > { %1468 = vmatpush1.bf16.msra.mxu0 %v1467_v23  ;;  %v554_v23 = vld [vmem:[%s2611_s4] sm:$0x3] }
 0x1ad   : > { %v447_v25 = vpop.xlane.xlu0 %446 }
 0x1ae   : > { %v462_v26 = vmul.f32 0.0078125, %v447_v25 }
 0x1b0   : > { %v470_v27 = vadd.f32 1e-05, %v462_v26 }
 0x1b1   : > { %v449_v28 = vpop.xlane.xlu1 %448  ;;  %v451_v29 = vpop.xlane.xlu0 %450 }
 0x1b2   : > { %1585 = vrsqrt.f32 %v470_v27  ;;  %v463_v32 = vmul.f32 0.0078125, %v449_v28  ;;  %v464_v33 = vmul.f32 0.0078125, %v451_v29 }
 0x1b4   : > { %v471_v34 = vadd.f32 1e-05, %v463_v32  ;;  %v472_v35 = vadd.f32 1e-05, %v464_v33 }
 0x1b5   : > { %v453_v36 = vpop.xlane.xlu1 %452  ;;  %v455_v39 = vpop.xlane.xlu0 %454 }
 0x1b6   : > { %1587 = vrsqrt.f32 %v471_v34  ;;  %v465_v40 = vmul.f32 0.0078125, %v453_v36  ;;  %v466_v41 = vmul.f32 0.0078125, %v455_v39 }
 0x1b7   : > { %1589 = vrsqrt.f32 %v472_v35 }
 0x1b8   : > { %v473_v42 = vadd.f32 1e-05, %v465_v40  ;;  %v474_v43 = vadd.f32 1e-05, %v466_v41 }
 0x1b9   : > { %v457_v44 = vpop.xlane.xlu1 %456  ;;  %v459_v47 = vpop.xlane.xlu0 %458 }
 0x1ba   : > { %1591 = vrsqrt.f32 %v473_v42  ;;  %v467_v48 = vmul.f32 0.0078125, %v457_v44  ;;  %v468_v51 = vmul.f32 0.0078125, %v459_v47 }
 0x1bb   : > { %1593 = vrsqrt.f32 %v474_v43 }
 0x1bc   : > { %v1586_v49 = vpop.eup %1585  ;;  %v475_v50 = vadd.f32 1e-05, %v467_v48  ;;  %v476_v60 = vadd.f32 1e-05, %v468_v51 }
 0x1bd   : > { %v461_v55 = vpop.xlane.xlu1 %460  ;;  %v486_v56 = vmul.f32 %v1586_v49, %v2143_v30 }
 0x1be   : > { %1595 = vrsqrt.f32 %v475_v50  ;;  %v469_v61 = vmul.f32 0.0078125, %v461_v55 }
 0x1bf   : > { %v500_v58 = vmul.f32 %v1355_v52, %v486_v56  ;;  %1597 = vrsqrt.f32 %v476_v60 }
 0x1c0   : > { %v1588_v59 = vpop.eup %1587  ;;  %v477_v4 = vadd.f32 1e-05, %v469_v61 }
 0x1c1   : > { %v1590_v62 = vpop.eup %1589  ;;  %v514_v63 = vadd.f32 %v1356_v57, %v500_v58  ;;  %v487_v0 = vmul.f32 %v1588_v59, %v2149_v37 }
 0x1c2   : > { %v488_v1 = vmul.f32 %v1590_v62, %v2145_v31  ;;  %1599 = vrsqrt.f32 %v477_v4 }
 0x1c3   : > { %631 = vmatmul.mubr.f32.vlgmr.msra.gmra.mrb[0].mxu0 %v514_v63  ;;  %v501_v2 = vmul.f32 %v1355_v52, %v487_v0 }
 0x1c4   : > { %v1592_v3 = vpop.eup %1591  ;;  %636 = vmatprep.mubr.f32.mxu0 %v1879_v24  ;;  %v502_v5 = vmul.f32 %v1355_v52, %v488_v1 }
 0x1c5   : > { %v515_v30 = vadd.f32 %v1356_v57, %v501_v2  ;;  %v489_v6 = vmul.f32 %v1592_v3, %v2151_v38  ;;  %v1594_v7 = vpop.eup %1593 }
 0x1c6   : > { %v516_v8 = vadd.f32 %v1356_v57, %v502_v5  ;;  %v490_v31 = vmul.f32 %v1594_v7, %v2157_v45 }
 0x1c7   : > { %637 = vmatmul.mubr.f32.gmra.mrb[2].mxu0 %v515_v30  ;;  %v503_v37 = vmul.f32 %v1355_v52, %v489_v6 }
 0x1c8   : > { %642 = vmatprep.mubr.f32.mxu0 %v1879_v24  ;;  %v1596_v9 = vpop.eup %1595  ;;  %v504_v11 = vmul.f32 %v1355_v52, %v490_v31 }
 0x1c9   : > { %v517_v10 = vadd.f32 %v1356_v57, %v503_v37  ;;  %v491_v12 = vmul.f32 %v1596_v9, %v2159_v46  ;;  %v1598_v13 = vpop.eup %1597 }
 0x1ca   : > { %v518_v38 = vadd.f32 %v1356_v57, %v504_v11  ;;  %v492_v15 = vmul.f32 %v1598_v13, %v2165_v53  ;;  %v557_v53 = vshrl.u32 %v556_v21, 7 }
 0x1cb   : > { %643 = vmatmul.mubr.f32.gmra.mrb[4].mxu0 %v516_v8  ;;  %v505_v14 = vmul.f32 %v1355_v52, %v491_v12 }
 0x1cc   : > { %648 = vmatprep.mubr.f32.mxu0 %v1879_v24  ;;  %v1600_v16 = vpop.eup %1599  ;;  %v506_v17 = vmul.f32 %v1355_v52, %v492_v15  ;;  %v2194_v22 = vsub.s32 0, %v557_v53  ;;  %v2199_v25 = vsub.s32 1, %v557_v53 }
 0x1cd   : > { %v519_v45 = vadd.f32 %v1356_v57, %v505_v14  ;;  %v493_v18 = vmul.f32 %v1600_v16, %v2167_v54 }
 0x1ce   : > { %v520_v46 = vadd.f32 %v1356_v57, %v506_v17  ;;  %v2202_v54 = vrot.slane %v554_v23, %v2194_v22  ;;  %v2205_v26 = vrot.slane %v554_v23, %v2199_v25 }
 0x1cf   : > { %649 = vmatmul.mubr.f32.gmra.mrb[6].mxu0 %v517_v10  ;;  %v507_v19 = vmul.f32 %v1355_v52, %v493_v18 }
 0x1d0   : > { %654 = vmatprep.mubr.f32.mxu0 %v1879_v24 }
 0x1d1   : > { %v521_v20 = vadd.f32 %v1356_v57, %v507_v19 }
 0x1d3   : > { %655 = vmatmul.mubr.f32.gmra.mrb[8].mxu0 %v518_v38 }
 0x1d4   : > { %660 = vmatprep.mubr.f32.mxu0 %v1879_v24 }
 0x1d7   : > { %661 = vmatmul.mubr.f32.gmra.mrb[10].mxu0 %v519_v45 }
 0x1d8   : > { %666 = vmatprep.mubr.f32.mxu0 %v1879_v24 }
 0x1db   : > { %667 = vmatmul.mubr.f32.gmra.mrb[12].mxu0 %v520_v46 }
 0x1dc   : > { %672 = vmatprep.mubr.f32.mxu0 %v1879_v24 }
 0x1df   : > { %673 = vmatmul.mubr.f32.gmra.mrb[14].mxu0 %v521_v20 }
 0x296   : > { %v632_v27 = vpop.f32.mrb[0].mxu0 }
 0x297   : > { %v2208_v24 = vadd.f32 %v632_v27, %v2202_v54  ;;  %v634_v28 = vpop.f32.mrb[1].mxu0 }
 0x298   : > { %v2211_v29 = vadd.f32 %v634_v28, %v2205_v26 }
 0x299   : > { %v679_v32 = vmin.f32 %v2208_v24, 20.0  ;;  %vm839_vm0 = vcmp.gt.f32.partialorder %v2208_v24, 20.0 }
 0x29a   : > { %v680_v33 = vmin.f32 %v2211_v29, 20.0  ;;  %v638_v34 = vpop.f32.mrb[2].mxu0  ;;  %vm840_vm1 = vcmp.gt.f32.partialorder %v2211_v29, 20.0 }
 0x29b   : > { %v695_v35 = vmul.f32 1.442695, %v679_v32  ;;  %v2216_v36 = vadd.f32 %v638_v34, %v2202_v54  ;;  %v640_v39 = vpop.f32.mrb[3].mxu0 }
 0x29c   : > { %v697_v40 = vmul.f32 1.442695, %v680_v33  ;;  %v2219_v41 = vadd.f32 %v640_v39, %v2205_v26 }
 0x29d   : > { %1601 = vpow2.f32 %v695_v35  ;;  %v681_v42 = vmin.f32 %v2216_v36, 20.0  ;;  %vm841_vm2 = vcmp.gt.f32.partialorder %v2216_v36, 20.0 }
 0x29e   : > { %1603 = vpow2.f32 %v697_v40  ;;  %v682_v43 = vmin.f32 %v2219_v41, 20.0  ;;  %v644_v44 = vpop.f32.mrb[4].mxu0  ;;  %vm842_vm3 = vcmp.gt.f32.partialorder %v2219_v41, 20.0 }
 0x29f   : > { %v699_v47 = vmul.f32 1.442695, %v681_v42  ;;  %v2224_v48 = vadd.f32 %v644_v44, %v2202_v54  ;;  %v646_v49 = vpop.f32.mrb[5].mxu0 }
 0x2a0   : > { %v701_v50 = vmul.f32 1.442695, %v682_v43  ;;  %v2227_v51 = vadd.f32 %v646_v49, %v2205_v26 }
 0x2a1   : > { %1605 = vpow2.f32 %v699_v47  ;;  %v683_v52 = vmin.f32 %v2224_v48, 20.0  ;;  %vm843_vm4 = vcmp.gt.f32.partialorder %v2224_v48, 20.0 }
 0x2a2   : > { %1607 = vpow2.f32 %v701_v50  ;;  %v684_v55 = vmin.f32 %v2227_v51, 20.0  ;;  %v650_v56 = vpop.f32.mrb[6].mxu0  ;;  %vm844_vm5 = vcmp.gt.f32.partialorder %v2227_v51, 20.0 }
 0x2a3   : > { %v703_v57 = vmul.f32 1.442695, %v683_v52  ;;  %v2232_v58 = vadd.f32 %v650_v56, %v2202_v54  ;;  %v652_v59 = vpop.f32.mrb[7].mxu0 }
 0x2a4   : > { %v705_v60 = vmul.f32 1.442695, %v684_v55  ;;  %v2235_v61 = vadd.f32 %v652_v59, %v2205_v26 }
 0x2a5   : > { %1609 = vpow2.f32 %v703_v57  ;;  %v685_v62 = vmin.f32 %v2232_v58, 20.0  ;;  %vm845_vm6 = vcmp.gt.f32.partialorder %v2232_v58, 20.0 }
 0x2a6   : > { %1611 = vpow2.f32 %v705_v60  ;;  %v686_v63 = vmin.f32 %v2235_v61, 20.0  ;;  %v656_v0 = vpop.f32.mrb[8].mxu0  ;;  %vm846_vm7 = vcmp.gt.f32.partialorder %v2235_v61, 20.0 }
 0x2a7   : > { %v1602_v1 = vpop.eup %1601  ;;  %v707_v2 = vmul.f32 1.442695, %v685_v62  ;;  %v2240_v3 = vadd.f32 %v656_v0, %v2202_v54  ;;  %v658_v4 = vpop.f32.mrb[9].mxu0 }
 0x2a8   : > { %v1604_v30 = vpop.eup %1603  ;;  %v727_v5 = vadd.f32 1.0, %v1602_v1  ;;  %v709_v6 = vmul.f32 1.442695, %v686_v63  ;;  %v2243_v7 = vadd.f32 %v658_v4, %v2205_v26 }
 0x2a9   : > { %v728_v8 = vadd.f32 1.0, %v1604_v30  ;;  %1613 = vpow2.f32 %v707_v2  ;;  %v687_v37 = vmin.f32 %v2240_v3, 20.0  ;;  %vm847_vm8 = vcmp.gt.f32.partialorder %v2240_v3, 20.0 }
 0x2aa   : > { %v743_v31 = vmul.f32 %v727_v5, %v727_v5  ;;  %1615 = vpow2.f32 %v709_v6  ;;  %v688_v9 = vmin.f32 %v2243_v7, 20.0  ;;  %v662_v10 = vpop.f32.mrb[10].mxu0  ;;  %vm848_vm9 = vcmp.gt.f32.partialorder %v2243_v7, 20.0 }
 0x2ab   : > { %v1606_v11 = vpop.eup %1605  ;;  %v744_v12 = vmul.f32 %v728_v8, %v728_v8  ;;  %v711_v13 = vmul.f32 1.442695, %v687_v37  ;;  %v2248_v38 = vadd.f32 %v662_v10, %v2202_v54  ;;  %v664_v14 = vpop.f32.mrb[11].mxu0 }
 0x2ac   : > { %v1608_v15 = vpop.eup %1607  ;;  %v759_v16 = vadd.f32 1.0, %v743_v31  ;;  %v729_v45 = vadd.f32 1.0, %v1606_v11  ;;  %v713_v17 = vmul.f32 1.442695, %v688_v9  ;;  %v2251_v18 = vadd.f32 %v664_v14, %v2205_v26 }
 0x2ad   : > { %v760_v46 = vadd.f32 1.0, %v744_v12  ;;  %v730_v19 = vadd.f32 1.0, %v1608_v15  ;;  %1617 = vpow2.f32 %v711_v13  ;;  %v689_v20 = vmin.f32 %v2248_v38, 20.0 }
 0x2ae   : > { %1619 = vrcp.f32 %v759_v16  ;;  %v745_v21 = vmul.f32 %v729_v45, %v729_v45  ;;  %v690_v53 = vmin.f32 %v2251_v18, 20.0  ;;  %v668_v23 = vpop.f32.mrb[12].mxu0  ;;  %v1357_v27 = vadd.f32 -1.0, %v743_v31 }
 0x2af   : > { %v1610_v28 = vpop.eup %1609  ;;  %1621 = vrcp.f32 %v760_v46  ;;  %v746_v32 = vmul.f32 %v730_v19, %v730_v19  ;;  %v715_v33 = vmul.f32 1.442695, %v689_v20  ;;  %v2256_v34 = vadd.f32 %v668_v23, %v2202_v54  ;;  %v670_v35 = vpop.f32.mrb[13].mxu0 }
 0x2b0   : > { %v1612_v39 = vpop.eup %1611  ;;  %v761_v40 = vadd.f32 1.0, %v745_v21  ;;  %v731_v42 = vadd.f32 1.0, %v1610_v28  ;;  %1623 = vpow2.f32 %v713_v17  ;;  %v717_v43 = vmul.f32 1.442695, %v690_v53 }
 0x2b1   : > { %v762_v44 = vadd.f32 1.0, %v746_v32  ;;  %v732_v47 = vadd.f32 1.0, %v1612_v39  ;;  %1625 = vpow2.f32 %v715_v33  ;;  %v691_v49 = vmin.f32 %v2256_v34, 20.0 }
 0x2b2   : > { %1627 = vrcp.f32 %v761_v40  ;;  %v747_v50 = vmul.f32 %v731_v42, %v731_v42  ;;  %v2260_v52 = vadd.f32 %v670_v35, %v2205_v26  ;;  %v674_v55 = vpop.f32.mrb[14].mxu0  ;;  %v1358_v56 = vadd.f32 -1.0, %v744_v12 }
 0x2b3   : > { %v1614_v57 = vpop.eup %1613  ;;  %1629 = vrcp.f32 %v762_v44  ;;  %v748_v59 = vmul.f32 %v732_v47, %v732_v47  ;;  %v719_v60 = vmul.f32 1.442695, %v691_v49  ;;  %v2263_v62 = vadd.f32 %v674_v55, %v2202_v54  ;;  %v676_v63 = vpop.f32.mrb[15].mxu0 }
 0x2b4   : > { %v1616_v0 = vpop.eup %1615  ;;  %v763_v1 = vadd.f32 1.0, %v747_v50  ;;  %v733_v2 = vadd.f32 1.0, %v1614_v57  ;;  %1631 = vpow2.f32 %v717_v43  ;;  %v692_v4 = vmin.f32 %v2260_v52, 20.0 }
 0x2b5   : > { %v764_v30 = vadd.f32 1.0, %v748_v59  ;;  %v734_v5 = vadd.f32 1.0, %v1616_v0  ;;  %1633 = vpow2.f32 %v719_v60  ;;  %v693_v6 = vmin.f32 %v2263_v62, 20.0 }
 0x2b6   : > { %1635 = vrcp.f32 %v763_v1  ;;  %v749_v8 = vmul.f32 %v733_v2, %v733_v2  ;;  %v721_v54 = vmul.f32 1.442695, %v692_v4  ;;  %v2270_v37 = vadd.f32 %v676_v63, %v2205_v26 }
 0x2b7   : > { %v1618_v31 = vpop.eup %1617  ;;  %1637 = vrcp.f32 %v764_v30  ;;  %v2272_v9 = vmul.f32 %v734_v5, %v734_v5  ;;  %v723_v10 = vmul.f32 1.442695, %v693_v6  ;;  %v1359_v11 = vadd.f32 -1.0, %v745_v21 }
 0x2b8   : > { %v1620_v12 = vpop.eup %1619  ;;  %v765_v13 = vadd.f32 1.0, %v749_v8  ;;  %v735_v14 = vadd.f32 1.0, %v1618_v31  ;;  %1639 = vpow2.f32 %v721_v54  ;;  %v694_v15 = vmin.f32 %v2270_v37, 20.0 }
 0x2b9   : > { %v1622_v16 = vpop.eup %1621  ;;  %v766_v45 = vadd.f32 1.0, %v2272_v9  ;;  %1641 = vpow2.f32 %v723_v10  ;;  %v823_v26 = vmul.f32 %v1620_v12, %v1357_v27  ;;  %v1360_v17 = vadd.f32 -1.0, %v746_v32 }
 0x2ba   : > { %v1624_v46 = vpop.eup %1623  ;;  %1643 = vrcp.f32 %v765_v13  ;;  %v2278_v19 = vmul.f32 %v735_v14, %v735_v14  ;;  %v725_v20 = vmul.f32 1.442695, %v694_v15  ;;  %v824_v21 = vmul.f32 %v1622_v16, %v1358_v56 }
 0x2bb   : > { %v1626_v53 = vpop.eup %1625  ;;  %1645 = vrcp.f32 %v766_v45  ;;  %v736_v23 = vadd.f32 1.0, %v1624_v46  ;;  %v855_v28 = vmul.f32 %v823_v26, %v2208_v24  ;;  %v1361_v33 = vadd.f32 -1.0, %v747_v50 }
 0x2bc   : > { %v1628_v35 = vpop.eup %1627  ;;  %v767_v39 = vadd.f32 1.0, %v2278_v19  ;;  %v737_v40 = vadd.f32 1.0, %v1626_v53  ;;  %1647 = vpow2.f32 %v725_v20  ;;  %v856_v27 = vmul.f32 %v824_v21, %v2211_v29 }
 0x2bd   : > { %v1630_v32 = vpop.eup %1629  ;;  %v2284_v42 = vmul.f32 %v736_v23, %v736_v23  ;;  %v2289_v43 = vsel %vm839_vm0, %v2208_v24, %v855_v28  ;;  %v825_v44 = vmul.f32 %v1628_v35, %v1359_v11  ;;  %v1362_v47 = vadd.f32 -1.0, %v748_v59 }
 0x2be   : > { %v1632_v49 = vpop.eup %1631  ;;  %1649 = vrcp.f32 %v767_v39  ;;  %v2292_v50 = vmul.f32 %v737_v40, %v737_v40  ;;  %v2297_v55 = vsel %vm840_vm1, %v2211_v29, %v856_v27  ;;  %v826_v56 = vmul.f32 %v1630_v32, %v1360_v17 }
 0x2bf   : > { %v1634_v57 = vpop.eup %1633  ;;  %v768_v60 = vadd.f32 1.0, %v2284_v42  ;;  %v738_v63 = vadd.f32 1.0, %v1632_v49  ;;  %v889_v24 = vadd.f32 %v2297_v55, %v2289_v43  ;;  %v857_v59 = vmul.f32 %v825_v44, %v2216_v36 }
 0x2c0   : > { %v1636_v0 = vpop.eup %1635  ;;  %v769_v1 = vadd.f32 1.0, %v2292_v50  ;;  %v739_v2 = vadd.f32 1.0, %v1634_v57  ;;  %v858_v4 = vmul.f32 %v826_v56, %v2219_v41  ;;  %v1363_v30 = vadd.f32 -1.0, %v749_v8 }
 0x2c1   : > { %v1638_v5 = vpop.eup %1637  ;;  %1651 = vrcp.f32 %v768_v60  ;;  %v754_v29 = vmul.f32 %v738_v63, %v738_v63  ;;  %890 = vadd.xlane.f32.xlu0 %v889_v24  ;;  %v2308_v6 = vsel %vm841_vm2, %v2216_v36, %v857_v59  ;;  %v827_v54 = vmul.f32 %v1636_v0, %v1361_v33 }
 0x2c2   : > { %v1640_v31 = vpop.eup %1639  ;;  %1653 = vrcp.f32 %v769_v1  ;;  %v755_v10 = vmul.f32 %v739_v2, %v739_v2  ;;  %v2313_v11 = vsel %vm842_vm3, %v2219_v41, %v858_v4  ;;  %v828_v12 = vmul.f32 %v1638_v5, %v1362_v47 }
 0x2c3   : > { %v1642_v8 = vpop.eup %1641  ;;  %v770_v13 = vadd.f32 1.0, %v754_v29  ;;  %v740_v14 = vadd.f32 1.0, %v1640_v31  ;;  %v892_v15 = vadd.f32 %v2313_v11, %v2308_v6  ;;  %v859_v16 = vmul.f32 %v827_v54, %v2224_v48 }
 0x2c4   : > { %v1644_v36 = vpop.eup %1643  ;;  %v771_v45 = vadd.f32 1.0, %v755_v10  ;;  %v741_v26 = vadd.f32 1.0, %v1642_v8  ;;  %v860_v17 = vmul.f32 %v828_v12, %v2227_v51  ;;  %v1364_v46 = vadd.f32 -1.0, %v2272_v9 }
 0x2c5   : > { %v1646_v20 = vpop.eup %1645  ;;  %1655 = vrcp.f32 %v770_v13  ;;  %v756_v41 = vmul.f32 %v740_v14, %v740_v14  ;;  %893 = vadd.xlane.f32.xlu1 %v892_v15  ;;  %v2323_v21 = vsel %vm843_vm4, %v2224_v48, %v859_v16  ;;  %v829_v53 = vmul.f32 %v1644_v36, %v1363_v30 }
 0x2c6   : > { %v1648_v23 = vpop.eup %1647  ;;  %1657 = vrcp.f32 %v771_v45  ;;  %v757_v28 = vmul.f32 %v741_v26, %v741_v26  ;;  %v2328_v33 = vsel %vm844_vm5, %v2227_v51, %v860_v17  ;;  %v830_v35 = vmul.f32 %v1646_v20, %v1364_v46 }
 0x2c7   : > { %v772_v9 = vadd.f32 1.0, %v756_v41  ;;  %v742_v39 = vadd.f32 1.0, %v1648_v23  ;;  %v895_v40 = vadd.f32 %v2328_v33, %v2323_v21  ;;  %v861_v27 = vmul.f32 %v829_v53, %v2232_v58 }
 0x2c8   : > { %v1650_v32 = vpop.eup %1649  ;;  %v773_v48 = vadd.f32 1.0, %v757_v28  ;;  %v862_v44 = vmul.f32 %v830_v35, %v2235_v61  ;;  %v1365_v47 = vadd.f32 -1.0, %v2278_v19  ;;  %v1366_v57 = vadd.f32 -1.0, %v2284_v42 }
 0x2c9   : > { %1659 = vrcp.f32 %v772_v9  ;;  %v758_v49 = vmul.f32 %v742_v39, %v742_v39  ;;  %896 = vadd.xlane.f32.xlu0 %v895_v40  ;;  %v2338_v51 = vsel %vm845_vm6, %v2232_v58, %v861_v27  ;;  %v1367_v59 = vadd.f32 -1.0, %v2292_v50  ;;  %v1088_v39 = vld [vmem:[#allocation8 + $0x80] sm:$0xff]  ;;  %v1089_v40 = vld [vmem:[#allocation8 + $0x88] sm:$0xff] }
 0x2ca   : > { %1661 = vrcp.f32 %v773_v48  ;;  %v2341_v56 = vsel %vm846_vm7, %v2235_v61, %v862_v44  ;;  %v831_v60 = vmul.f32 %v1650_v32, %v1365_v47  ;;  %v1368_v4 = vadd.f32 -1.0, %v754_v29  ;;  %v1072_v27 = vld [vmem:[#allocation8] sm:$0xff]  ;;  %v1073_v48 = vld [vmem:[#allocation8 + $0x8] sm:$0xff]  ;;  %v1090_v44 = vld [vmem:[#allocation8 + $0x90] sm:$0xff] }
 0x2cb   : > { %v1652_v63 = vpop.eup %1651  ;;  %v774_v24 = vadd.f32 1.0, %v758_v49  ;;  %v898_v19 = vadd.f32 %v2341_v56, %v2338_v51  ;;  %v1369_v5 = vadd.f32 -1.0, %v755_v10  ;;  %vm849_vm10 = vcmp.gt.f32.partialorder %v2248_v38, 20.0  ;;  %v1091_v47 = vld [vmem:[#allocation8 + $0x98] sm:$0xff] }
 0x2cc   : > { %v1654_v0 = vpop.eup %1653  ;;  %v832_v1 = vmul.f32 %v1652_v63, %v1366_v57  ;;  %v863_v2 = vmul.f32 %v831_v60, %v2240_v3  ;;  %v1370_v14 = vadd.f32 -1.0, %v756_v41  ;;  %vm850_vm11 = vcmp.gt.f32.partialorder %v2251_v18, 20.0  ;;  %v1074_v57 = vld [vmem:[#allocation8 + $0x10] sm:$0xff]  ;;  %v1075_v60 = vld [vmem:[#allocation8 + $0x18] sm:$0xff]  ;;  %v1092_v63 = vld [vmem:[#allocation8 + $0xa0] sm:$0xff] }
 0x2cd   : > { %1663 = vrcp.f32 %v774_v24  ;;  %899 = vadd.xlane.f32.xlu1 %v898_v19  ;;  %v833_v58 = vmul.f32 %v1654_v0, %v1367_v59  ;;  %v1371_v10 = vadd.f32 -1.0, %v757_v28  ;;  %vm851_vm12 = vcmp.gt.f32.partialorder %v2256_v34, 20.0  ;;  %v1093_v24 = vld [vmem:[#allocation8 + $0xa8] sm:$0xff]  ;;  %v1076_v59 = vld [vmem:[#allocation8 + $0x20] sm:$0xff] }
 0x2ce   : > { %v864_v61 = vmul.f32 %v832_v1, %v2243_v7  ;;  %v2351_v42 = vsel %vm847_vm8, %v2240_v3, %v863_v2  ;;  %v1372_v20 = vadd.f32 -1.0, %v758_v49  ;;  %vm852_vm13 = vcmp.gt.f32.partialorder %v2260_v52, 20.0  ;;  %v1077_v0 = vld [vmem:[#allocation8 + $0x28] sm:$0xff] }
 0x2cf   : > { %v1656_v30 = vpop.eup %1655  ;;  %v865_v50 = vmul.f32 %v833_v58, %v2248_v38  ;;  %vm853_vm14 = vcmp.gt.f32.partialorder %v2263_v62, 20.0  ;;  %vm854_vm15 = vcmp.gt.f32.partialorder %v2270_v37, 20.0  ;;  %v1469_v32 = vpack.c.bf16 %v1089_v40, %v1088_v39 }
 0x2d0   : > { %v1658_v54 = vpop.eup %1657  ;;  %v2356_v31 = vsel %vm848_vm9, %v2243_v7, %v864_v61  ;;  %v834_v12 = vmul.f32 %v1656_v30, %v1368_v4  ;;  %v1471_v49 = vpack.c.bf16 %v1073_v48, %v1072_v27  ;;  %v1477_v19 = vpack.c.bf16 %v1093_v24, %v1092_v63 }
 0x2d1   : > { %v901_v8 = vadd.f32 %v2356_v31, %v2351_v42  ;;  %v835_v13 = vmul.f32 %v1658_v54, %v1369_v5  ;;  %v2363_v29 = vsel %vm849_vm10, %v2248_v38, %v865_v50  ;;  %1470 = vmatprep.subr.bf16.mxu1 %v1469_v32  ;;  %v1479_v1 = vpack.c.bf16 %v1077_v0, %v1076_v59  ;;  %v1096_v0 = vld [vmem:[#allocation8 + $0xc0] sm:$0xff] }
 0x2d2   : > { %v866_v3 = vmul.f32 %v834_v12, %v2251_v18  ;;  %1472 = vmatpush3.bf16.msra.mxu1 %v1471_v49  ;;  %v1078_v49 = vld [vmem:[#allocation8 + $0x30] sm:$0xff] }
 0x2d3   : > { %v1660_v15 = vpop.eup %1659  ;;  %902 = vadd.xlane.f32.xlu0 %v901_v8  ;;  %v867_v7 = vmul.f32 %v835_v13, %v2256_v34 }
 0x2d4   : > { %v1662_v16 = vpop.eup %1661  ;;  %v2368_v36 = vsel %vm850_vm11, %v2251_v18, %v866_v3  ;;  %v836_v45 = vmul.f32 %v1660_v15, %v1370_v14 }
 0x2d5   : > { %v904_v26 = vadd.f32 %v2368_v36, %v2363_v29  ;;  %v837_v38 = vmul.f32 %v1662_v16, %v1371_v10  ;;  %v2375_v46 = vsel %vm851_vm12, %v2256_v34, %v867_v7 }
 0x2d6   : > { %v868_v17 = vmul.f32 %v836_v45, %v2260_v52 }
 0x2d7   : > { %v1664_v41 = vpop.eup %1663  ;;  %905 = vadd.xlane.f32.xlu1 %v904_v26  ;;  %v869_v18 = vmul.f32 %v837_v38, %v2263_v62 }
 0x2d8   : > { %v2380_v53 = vsel %vm852_vm13, %v2260_v52, %v868_v17  ;;  %v838_v23 = vmul.f32 %v1664_v41, %v1372_v20 }
 0x2d9   : > { %v907_v28 = vadd.f32 %v2380_v53, %v2375_v46  ;;  %v2387_v34 = vsel %vm853_vm14, %v2263_v62, %v869_v18  ;;  %v1473_v62 = vpack.c.bf16 %v1091_v47, %v1090_v44  ;;  %v1094_v44 = vld [vmem:[#allocation8 + $0xb0] sm:$0xff]  ;;  %v1095_v47 = vld [vmem:[#allocation8 + $0xb8] sm:$0xff] }
 0x2da   : > { %v870_v35 = vmul.f32 %v838_v23, %v2270_v37 }
 0x2db   : > { %908 = vadd.xlane.f32.xlu0 %v907_v28  ;;  %1474 = vmatprep.subr.bf16.mxu1 %v1473_v62  ;;  %v1481_v62 = vpack.c.bf16 %v1095_v47, %v1094_v44 }
 0x2dc   : > { %v2391_v9 = vsel %vm854_vm15, %v2270_v37, %v870_v35  ;;  %v1475_v37 = vpack.c.bf16 %v1075_v60, %v1074_v57  ;;  %v1079_v57 = vld [vmem:[#allocation8 + $0x38] sm:$0xff] }
 0x2dd   : > { %v910_v52 = vadd.f32 %v2391_v9, %v2387_v34  ;;  %v1483_v63 = vpack.c.bf16 %v1079_v57, %v1078_v49  ;;  %v887_v49 = vld [vmem:[%s2612_s5] sm:$0x3] }
 0x2de   : > { %1476 = vmatpush3.bf16.msra.mxu1 %v1475_v37 }
 0x2df   : > { %911 = vadd.xlane.f32.xlu1 %v910_v52  ;;  %1478 = vmatprep.subr.bf16.mxu1 %v1477_v19 }
 0x2e2   : > { %1480 = vmatpush3.bf16.msra.mxu1 %v1479_v1  ;;  %v1097_v1 = vld [vmem:[#allocation8 + $0xc8] sm:$0xff] }
 0x2e3   : > { %1482 = vmatprep.subr.bf16.mxu1 %v1481_v62 }
 0x2e6   : > { %1484 = vmatpush3.bf16.msra.mxu1 %v1483_v63  ;;  %v2482_v63 = vrot.slane %v887_v49, %v2194_v22 }
 0x34e   : > { %v891_v2 = vpop.xlane.xlu0 %890 }
 0x34f   : > { %v914_v58 = vmul.f32 0.00390625, %v891_v2  ;;  %v1485_v2 = vpack.c.bf16 %v1097_v1, %v1096_v0 }
 0x351   : > { %v2396_v61 = vsub.f32 %v2289_v43, %v914_v58  ;;  %v2399_v4 = vsub.f32 %v2297_v55, %v914_v58  ;;  %v1081_v58 = vld [vmem:[#allocation8 + $0x48] sm:$0xff]  ;;  %1486 = vmatprep.subr.bf16.mxu1 %v1485_v2 }
 0x352   : > { %v894_v30 = vpop.xlane.xlu1 %893 }
 0x353   : > { %v915_v50 = vmul.f32 0.00390625, %v894_v30  ;;  %v938_v5 = vmul.f32 %v2396_v61, %v2396_v61  ;;  %v939_v54 = vmul.f32 %v2399_v4, %v2399_v4 }
 0x355   : > { %v2406_v12 = vsub.f32 %v2308_v6, %v915_v50  ;;  %v2409_v8 = vsub.f32 %v2313_v11, %v915_v50  ;;  %v954_v13 = vadd.f32 %v939_v54, %v938_v5 }
 0x356   : > { %v897_v43 = vpop.xlane.xlu0 %896 }
 0x357   : > { %v916_v3 = vmul.f32 0.00390625, %v897_v43  ;;  %955 = vadd.xlane.f32.xlu0 %v954_v13  ;;  %v940_v55 = vmul.f32 %v2406_v12, %v2406_v12  ;;  %v941_v14 = vmul.f32 %v2409_v8, %v2409_v8  ;;  %v1098_v43 = vld [vmem:[#allocation8 + $0xd0] sm:$0xff] }
 0x359   : > { %v2416_v15 = vsub.f32 %v2323_v21, %v916_v3  ;;  %v2419_v7 = vsub.f32 %v2328_v33, %v916_v3  ;;  %v957_v6 = vadd.f32 %v941_v14, %v940_v55  ;;  %v1099_v3 = vld [vmem:[#allocation8 + $0xd8] sm:$0xff]  ;;  %v1082_v55 = vld [vmem:[#allocation8 + $0x50] sm:$0xff] }
 0x35a   : > { %v900_v10 = vpop.xlane.xlu1 %899  ;;  %v1489_v14 = vpack.c.bf16 %v1099_v3, %v1098_v43 }
 0x35b   : > { %v917_v11 = vmul.f32 0.00390625, %v900_v10  ;;  %958 = vadd.xlane.f32.xlu1 %v957_v6  ;;  %v942_v16 = vmul.f32 %v2416_v15, %v2416_v15  ;;  %v943_v45 = vmul.f32 %v2419_v7, %v2419_v7 }
 0x35d   : > { %v2426_v26 = vsub.f32 %v2338_v51, %v917_v11  ;;  %v2429_v38 = vsub.f32 %v2341_v56, %v917_v11  ;;  %v960_v21 = vadd.f32 %v943_v45, %v942_v16  ;;  %v1101_v11 = vld [vmem:[#allocation8 + $0xe8] sm:$0xff]  ;;  %v1084_v16 = vld [vmem:[#allocation8 + $0x60] sm:$0xff] }
 0x35f   : > { %961 = vadd.xlane.f32.xlu0 %v960_v21  ;;  %v944_v33 = vmul.f32 %v2426_v26, %v2426_v26  ;;  %v945_v17 = vmul.f32 %v2429_v38, %v2429_v38  ;;  %v1085_v21 = vld [vmem:[#allocation8 + $0x68] sm:$0xff] }
 0x360   : > { %v903_v20 = vpop.xlane.xlu0 %902 }
 0x361   : > { %v918_v41 = vmul.f32 0.00390625, %v903_v20  ;;  %v963_v18 = vadd.f32 %v945_v17, %v944_v33  ;;  %v1495_v33 = vpack.c.bf16 %v1085_v21, %v1084_v16  ;;  %v1102_v17 = vld [vmem:[#allocation8 + $0xf0] sm:$0xff]  ;;  %v1103_v20 = vld [vmem:[#allocation8 + $0xf8] sm:$0xff] }
 0x363   : > { %v2436_v23 = vsub.f32 %v2351_v42, %v918_v41  ;;  %v2439_v51 = vsub.f32 %v2356_v31, %v918_v41  ;;  %964 = vadd.xlane.f32.xlu1 %v963_v18  ;;  %v1086_v41 = vld [vmem:[#allocation8 + $0x70] sm:$0xff]  ;;  %v1497_v18 = vpack.c.bf16 %v1103_v20, %v1102_v17 }
 0x364   : > { %v906_v56 = vpop.xlane.xlu1 %905 }
 0x365   : > { %v919_v28 = vmul.f32 0.00390625, %v906_v56  ;;  %v946_v35 = vmul.f32 %v2436_v23, %v2436_v23  ;;  %v947_v52 = vmul.f32 %v2439_v51, %v2439_v51  ;;  %v1087_v56 = vld [vmem:[#allocation8 + $0x78] sm:$0xff] }
 0x367   : > { %v2446_v39 = vsub.f32 %v2363_v29, %v919_v28  ;;  %v2449_v40 = vsub.f32 %v2368_v36, %v919_v28  ;;  %v966_v42 = vadd.f32 %v947_v52, %v946_v35  ;;  %v1499_v28 = vpack.c.bf16 %v1087_v56, %v1086_v41 }
 0x368   : > { %v909_v27 = vpop.xlane.xlu0 %908 }
 0x369   : > { %v920_v32 = vmul.f32 0.00390625, %v909_v27  ;;  %967 = vadd.xlane.f32.xlu0 %v966_v42  ;;  %v948_v31 = vmul.f32 %v2446_v39, %v2446_v39  ;;  %v949_v48 = vmul.f32 %v2449_v40, %v2449_v40 }
 0x36b   : > { %v2456_v29 = vsub.f32 %v2375_v46, %v920_v32  ;;  %v2459_v36 = vsub.f32 %v2380_v53, %v920_v32  ;;  %v969_v60 = vadd.f32 %v949_v48, %v948_v31  ;;  %v1080_v46 = vld [vmem:[#allocation8 + $0x40] sm:$0xff] }
 0x36c   : > { %v912_v24 = vpop.xlane.xlu1 %911  ;;  %v1487_v5 = vpack.c.bf16 %v1081_v58, %v1080_v46 }
 0x36d   : > { %v921_v37 = vmul.f32 0.00390625, %v912_v24  ;;  %970 = vadd.xlane.f32.xlu1 %v969_v60  ;;  %v950_v19 = vmul.f32 %v2456_v29, %v2456_v29  ;;  %v951_v59 = vmul.f32 %v2459_v36, %v2459_v36  ;;  %v888_v60 = vld [vmem:[%s2613_s6] sm:$0x3]  ;;  %v2485_v24 = vrot.slane %v887_v49, %v2199_v25 }
 0x36e   : > { %1488 = vmatpush3.bf16.msra.mxu1 %v1487_v5  ;;  %v2489_v0 = vrot.slane %v888_v60, %v2194_v22  ;;  %v2492_v1 = vrot.slane %v888_v60, %v2199_v25 }
 0x36f   : > { %v2466_v53 = vsub.f32 %v2387_v34, %v921_v37  ;;  %v2469_v30 = vsub.f32 %v2391_v9, %v921_v37  ;;  %v972_v50 = vadd.f32 %v951_v59, %v950_v19  ;;  %v1083_v34 = vld [vmem:[#allocation8 + $0x58] sm:$0xff]  ;;  %1490 = vmatprep.subr.bf16.mxu1 %v1489_v14  ;;  %v1100_v9 = vld [vmem:[#allocation8 + $0xe0] sm:$0xff] }
 0x370   : > { %v1491_v10 = vpack.c.bf16 %v1083_v34, %v1082_v55  ;;  %v1493_v45 = vpack.c.bf16 %v1101_v11, %v1100_v9 }
 0x371   : > { %973 = vadd.xlane.f32.xlu0 %v972_v50  ;;  %v952_v54 = vmul.f32 %v2466_v53, %v2466_v53  ;;  %v953_v13 = vmul.f32 %v2469_v30, %v2469_v30 }
 0x372   : > { %1492 = vmatpush3.bf16.msra.mxu1 %v1491_v10 }
 0x373   : > { %v975_v6 = vadd.f32 %v953_v13, %v952_v54  ;;  %1494 = vmatprep.subr.bf16.mxu1 %v1493_v45 }
 0x375   : > { %976 = vadd.xlane.f32.xlu1 %v975_v6 }
 0x376   : > { %1496 = vmatpush3.bf16.msra.mxu1 %v1495_v33 }
 0x377   : > { %1498 = vmatprep.subr.bf16.mxu1 %v1497_v18 }
 0x37a   : > { %1500 = vmatpush3.bf16.msra.mxu1 %v1499_v28 }
 0x3e4   : > { %v956_v35 = vpop.xlane.xlu0 %955 }
 0x3e5   : > { %v978_v52 = vmul.f32 0.00390625, %v956_v35 }
 0x3e7   : > { %v986_v42 = vadd.f32 1e-05, %v978_v52 }
 0x3e8   : > { %v959_v27 = vpop.xlane.xlu1 %958 }
 0x3e9   : > { %1665 = vrsqrt.f32 %v986_v42  ;;  %v979_v32 = vmul.f32 0.00390625, %v959_v27 }
 0x3eb   : > { %v987_v31 = vadd.f32 1e-05, %v979_v32 }
 0x3ec   : > { %v962_v48 = vpop.xlane.xlu0 %961 }
 0x3ed   : > { %1667 = vrsqrt.f32 %v987_v31  ;;  %v980_v44 = vmul.f32 0.00390625, %v962_v48 }
 0x3ef   : > { %v988_v47 = vadd.f32 1e-05, %v980_v44 }
 0x3f0   : > { %v965_v62 = vpop.xlane.xlu1 %964 }
 0x3f1   : > { %1669 = vrsqrt.f32 %v988_v47  ;;  %v981_v57 = vmul.f32 0.00390625, %v965_v62 }
 0x3f3   : > { %v1666_v37 = vpop.eup %1665  ;;  %v989_v19 = vadd.f32 1e-05, %v981_v57 }
 0x3f4   : > { %v1003_v59 = vmul.f32 %v1666_v37, %v2399_v4  ;;  %v1002_v46 = vmul.f32 %v1666_v37, %v2396_v61 }
 0x3f5   : > { %1671 = vrsqrt.f32 %v989_v19 }
 0x3f6   : > { %v968_v2 = vpop.xlane.xlu0 %967  ;;  %v1030_v58 = vmul.f32 %v2485_v24, %v1003_v59  ;;  %v1029_v50 = vmul.f32 %v2482_v63, %v1002_v46 }
 0x3f7   : > { %v1668_v5 = vpop.eup %1667  ;;  %v982_v54 = vmul.f32 0.00390625, %v968_v2 }
 0x3f8   : > { %v1057_v13 = vadd.f32 %v2492_v1, %v1030_v58  ;;  %v1056_v4 = vadd.f32 %v2489_v0, %v1029_v50  ;;  %v1005_v22 = vmul.f32 %v1668_v5, %v2409_v8  ;;  %v1004_v43 = vmul.f32 %v1668_v5, %v2406_v12 }
 0x3f9   : > { %v990_v25 = vadd.f32 1e-05, %v982_v54 }
 0x3fa   : > { %v971_v3 = vpop.xlane.xlu1 %970  ;;  %1175 = vmatprep.mubr.f32.mxu1 %v1057_v13  ;;  %v1032_v61 = vmul.f32 %v2485_v24, %v1005_v22  ;;  %v1031_v55 = vmul.f32 %v2482_v63, %v1004_v43 }
 0x3fb   : > { %v1670_v14 = vpop.eup %1669  ;;  %1673 = vrsqrt.f32 %v990_v25  ;;  %v983_v34 = vmul.f32 0.00390625, %v971_v3  ;;  %1176 = vmatmul.mubr.f32.vlgmr.msra.gmra.mrb[0].mxu1 %v1056_v4 }
 0x3fc   : > { %v1059_v6 = vadd.f32 %v2492_v1, %v1032_v61  ;;  %v1058_v10 = vadd.f32 %v2489_v0, %v1031_v55  ;;  %v1007_v9 = vmul.f32 %v1670_v14, %v2419_v7  ;;  %v1006_v8 = vmul.f32 %v1670_v14, %v2416_v15 }
 0x3fd   : > { %v991_v12 = vadd.f32 1e-05, %v983_v34 }
 0x3fe   : > { %v974_v11 = vpop.xlane.xlu0 %973  ;;  %1180 = vmatprep.mubr.f32.mxu1 %v1059_v6  ;;  %v1034_v16 = vmul.f32 %v2485_v24, %v1007_v9  ;;  %v1033_v45 = vmul.f32 %v2482_v63, %v1006_v8 }
 0x3ff   : > { %v1672_v21 = vpop.eup %1671  ;;  %1675 = vrsqrt.f32 %v991_v12  ;;  %v984_v33 = vmul.f32 0.00390625, %v974_v11  ;;  %1181 = vmatmul.mubr.f32.gmra.mrb[2].mxu1 %v1058_v10 }
 0x400   : > { %v1061_v17 = vadd.f32 %v2492_v1, %v1034_v16  ;;  %v1060_v20 = vadd.f32 %v2489_v0, %v1033_v45  ;;  %v1009_v41 = vmul.f32 %v1672_v21, %v2429_v38  ;;  %v1008_v7 = vmul.f32 %v1672_v21, %v2426_v26 }
 0x401   : > { %v992_v15 = vadd.f32 1e-05, %v984_v33 }
 0x402   : > { %v977_v18 = vpop.xlane.xlu1 %976  ;;  %1185 = vmatprep.mubr.f32.mxu1 %v1061_v17  ;;  %v1036_v56 = vmul.f32 %v2485_v24, %v1009_v41  ;;  %v1035_v28 = vmul.f32 %v2482_v63, %v1008_v7 }
 0x403   : > { %1677 = vrsqrt.f32 %v992_v15  ;;  %v985_v35 = vmul.f32 0.00390625, %v977_v18  ;;  %1186 = vmatmul.mubr.f32.gmra.mrb[4].mxu1 %v1060_v20 }
 0x404   : > { %v1063_v52 = vadd.f32 %v2492_v1, %v1036_v56  ;;  %v1062_v42 = vadd.f32 %v2489_v0, %v1035_v28 }
 0x405   : > { %v1674_v27 = vpop.eup %1673  ;;  %v993_v32 = vadd.f32 1e-05, %v985_v35 }
 0x406   : > { %1190 = vmatprep.mubr.f32.mxu1 %v1063_v52  ;;  %v1011_v38 = vmul.f32 %v1674_v27, %v2439_v51  ;;  %v1010_v26 = vmul.f32 %v1674_v27, %v2436_v23 }
 0x407   : > { %1679 = vrsqrt.f32 %v993_v32  ;;  %1191 = vmatmul.mubr.f32.gmra.mrb[6].mxu1 %v1062_v42 }
 0x408   : > { %v1038_v31 = vmul.f32 %v2485_v24, %v1011_v38  ;;  %v1037_v48 = vmul.f32 %v2482_v63, %v1010_v26 }
 0x409   : > { %v1676_v44 = vpop.eup %1675 }
 0x40a   : > { %v1065_v47 = vadd.f32 %v2492_v1, %v1038_v31  ;;  %v1064_v49 = vadd.f32 %v2489_v0, %v1037_v48  ;;  %v1013_v62 = vmul.f32 %v1676_v44, %v2449_v40  ;;  %v1012_v57 = vmul.f32 %v1676_v44, %v2446_v39 }
 0x40c   : > { %1195 = vmatprep.mubr.f32.mxu1 %v1065_v47  ;;  %v1040_v51 = vmul.f32 %v2485_v24, %v1013_v62  ;;  %v1039_v23 = vmul.f32 %v2482_v63, %v1012_v57 }
 0x40d   : > { %v1678_v60 = vpop.eup %1677  ;;  %1196 = vmatmul.mubr.f32.gmra.mrb[8].mxu1 %v1064_v49 }
 0x40e   : > { %v1067_v37 = vadd.f32 %v2492_v1, %v1040_v51  ;;  %v1066_v19 = vadd.f32 %v2489_v0, %v1039_v23  ;;  %v1015_v59 = vmul.f32 %v1678_v60, %v2459_v36  ;;  %v1014_v46 = vmul.f32 %v1678_v60, %v2456_v29 }
 0x410   : > { %1200 = vmatprep.mubr.f32.mxu1 %v1067_v37  ;;  %v1042_v40 = vmul.f32 %v2485_v24, %v1015_v59  ;;  %v1041_v39 = vmul.f32 %v2482_v63, %v1014_v46 }
 0x411   : > { %v1680_v2 = vpop.eup %1679  ;;  %1201 = vmatmul.mubr.f32.gmra.mrb[10].mxu1 %v1066_v19 }
 0x412   : > { %v1069_v58 = vadd.f32 %v2492_v1, %v1042_v40  ;;  %v1068_v50 = vadd.f32 %v2489_v0, %v1041_v39  ;;  %v1017_v5 = vmul.f32 %v1680_v2, %v2469_v30  ;;  %v1016_v54 = vmul.f32 %v1680_v2, %v2466_v53  ;;  %v1373_v30 = vld [vmem:[%s2615_s8] ss:$0 sm:$0xff] }
 0x414   : > { %1205 = vmatprep.mubr.f32.mxu1 %v1069_v58  ;;  %v1044_v36 = vmul.f32 %v2485_v24, %v1017_v5  ;;  %v1043_v29 = vmul.f32 %v2482_v63, %v1016_v54 }
 0x415   : > { %1206 = vmatmul.mubr.f32.gmra.mrb[12].mxu1 %v1068_v50 }
 0x416   : > { %v1071_v13 = vadd.f32 %v2492_v1, %v1044_v36  ;;  %v1070_v4 = vadd.f32 %v2489_v0, %v1043_v29 }
 0x418   : > { %1210 = vmatprep.mubr.f32.mxu1 %v1071_v13 }
 0x419   : > { %1211 = vmatmul.mubr.f32.gmra.mrb[14].mxu1 %v1070_v4 }
 0x4ce   : > { %v1413_v22 = vpop.f32.mrb[0].mxu1 }
 0x4cf   : > { %v1414_v43 = vpop.f32.mrb[1].mxu1 }
 0x4d0   : > { %v1415_v53 = vadd.f32 %v1414_v43, %v1413_v22 }
 0x4d2   : > { %v1178_v25 = vadd.f32 %v1415_v53, %v1373_v30  ;;  %v1416_v3 = vpop.f32.mrb[2].mxu1 }
 0x4d3   : > { %v1417_v61 = vpop.f32.mrb[3].mxu1 }
 0x4d4   : > { %1216 = vst [vmem:[%s2546_s20] sm:$0xff] %v1178_v25  ;;  %v1418_v63 = vadd.f32 %v1417_v61, %v1416_v3 }
 0x4d6   : > { %v1183_v24 = vadd.f32 %v1418_v63, %v1373_v30  ;;  %v1419_v0 = vpop.f32.mrb[4].mxu1 }
 0x4d7   : > { %v1420_v1 = vpop.f32.mrb[5].mxu1 }
 0x4d8   : > { %1217 = vst [vmem:[%s2546_s20 + $0x8] sm:$0xff] %v1183_v24  ;;  %v1421_v55 = vadd.f32 %v1420_v1, %v1419_v0 }
 0x4da   : > { %v1188_v14 = vadd.f32 %v1421_v55, %v1373_v30  ;;  %v1422_v34 = vpop.f32.mrb[6].mxu1 }
 0x4db   : > { %v1423_v6 = vpop.f32.mrb[7].mxu1 }
 0x4dc   : > { %1218 = vst [vmem:[%s2546_s20 + $0x10] sm:$0xff] %v1188_v14  ;;  %v1424_v10 = vadd.f32 %v1423_v6, %v1422_v34 }
 0x4de   : > { %v1193_v9 = vadd.f32 %v1424_v10, %v1373_v30 }
 0x4e0   : > { %1219 = vst [vmem:[%s2546_s20 + $0x18] sm:$0xff] %v1193_v9  ;;  %v1425_v8 = vpop.f32.mrb[8].mxu1 }
 0x4e1   : > { %v1426_v12 = vpop.f32.mrb[9].mxu1 }
 0x4e2   : > { %v1427_v11 = vadd.f32 %v1426_v12, %v1425_v8 }
 0x4e4   : > { %v1198_v16 = vadd.f32 %v1427_v11, %v1373_v30  ;;  %v1428_v45 = vpop.f32.mrb[10].mxu1 }
 0x4e5   : > { %v1429_v21 = vpop.f32.mrb[11].mxu1 }
 0x4e6   : > { %1220 = vst [vmem:[%s2546_s20 + $0x20] sm:$0xff] %v1198_v16  ;;  %v1430_v33 = vadd.f32 %v1429_v21, %v1428_v45 }
 0x4e8   : > { %v1203_v17 = vadd.f32 %v1430_v33, %v1373_v30  ;;  %v1431_v20 = vpop.f32.mrb[12].mxu1 }
 0x4e9   : > { %v1432_v41 = vpop.f32.mrb[13].mxu1 }
 0x4ea   : > { %1221 = vst [vmem:[%s2546_s20 + $0x28] sm:$0xff] %v1203_v17  ;;  %v1433_v7 = vadd.f32 %v1432_v41, %v1431_v20 }
 0x4ec   : > { %v1208_v15 = vadd.f32 %v1433_v7, %v1373_v30  ;;  %v1434_v18 = vpop.f32.mrb[14].mxu1 }
 0x4ed   : > { %v1435_v56 = vpop.f32.mrb[15].mxu1 }
 0x4ee   : > { %1222 = vst [vmem:[%s2546_s20 + $0x30] sm:$0xff] %v1208_v15  ;;  %v1436_v28 = vadd.f32 %v1435_v56, %v1434_v18 }
 0x4f0   : > { %v1213_v35 = vadd.f32 %v1436_v28, %v1373_v30 }
 0x4f2   : > { %1223 = vst [vmem:[%s2546_s20 + $0x38] sm:$0xff] %v1213_v35 }
 0x4f3   : > { %1808 = shalt.err (!%p1805_p13)
}
 0x4f4   : > { %s1809_s24 = scalar_lea.hbm %s2562_s2, 1024  ;;  %s1813_s20 = scalar_lea.hbm %s2616_s9, 2048 }
 0x4f5   : > { %p1810_p0 = scmp.ne.s32.totalorder %s2562_s2, %s1809_s24  ;;  %p1814_p9 = scmp.lt.u32.totalorder %s2562_s2, %s2616_s9 }
 0x4f6   : > { %p1815_p12 = scmp.lt.u32.totalorder %s1813_s20, %s1809_s24  ;;  %p1817_p1 = scmp.lt.u32.totalorder %s1809_s24, %s2562_s2 }
 0x4f7   : > { %p1811_p5 = pnand %p1810_p0, %p2074_p6 }
 0x4f8   : > { %p1816_p2 = por %p1815_p12, %p1814_p9 }
 0x4f9   : > { %p1812_p11 = pneg %p1811_p5 }
 0x4fa   : > { %p1818_p4 = por %p1817_p1, %p1816_p2 }
 0x4fc   : > { %p1819_p8 = pnand %p1818_p4, %p1812_p11 }
 0x4fe   : > { %1822 = shalt.err (!%p1819_p8)
}
 0x4ff   : > { %s1881_s17 = smov 128   ;;  %s1882_s16 = smov 8  }
 0x500   : > { %1515 = dma.vmem_to_hbm [thread:$0]  (%p2074_p6), %s2556_s14, 1024, %s2562_s2, %s1225_s28, %s1881_s17, %s1881_s17, %s1882_s16  }
 0x501 PF: > { %s2640_s13 = sld [smem:[#allocation15_spill]]  ;;  %s1253_s29 = sand.u32 1, %s1857_s30  }
 0x502   : > { %p2642_p7 = scmp.ge.s32.totalorder %s1869_s12, 2  ;;  %s1254_s23 = scalar_lea.sflag [#allocation4], %s1253_s29 }
 0x507   : > { %p2641_p3 = scmp.ne.s32.totalorder %s2640_s13, 0 }
 0x509   : > { %p1532_p10 = pnand %p2642_p7, %p2641_p3 }
 0x50b   : > { %1852 = dma.done.wait (!%p1532_p10), %s1254_s23, 1024  }
 0x50c   : > { %1854 = vsyncadd (!%p1532_p10), %s1254_s23, 4294966272  ;;  %p24_p13 = scmp.ge.s32.totalorder %s2060_s26, 4   ;;  %s2643_s30 = smov %s1861_s10 }
 0x50d   : > { %s2644_s10 = smov %s1865_s11  ;;  %s2645_s11 = smov %s2070_s18 }
 0x50e   : > { %s2646_s12 = smov %s2060_s26  ;;  %26 = sbr.rel (!%p24_p13) target bundleno = 9 (0x9), region = 113 }
 0x515   :  { %1259 = vsyncpa [#allocation3], 1 }
 0x516   :  { %1261 = vsyncpa [#allocation3 + $0x1], 1 }
 0x517   :  { %1262 = vsyncpa [#allocation6], 1 }
 0x518   :  { %1263 = vsyncpa [#allocation9], 1 }
 0x519   :  { %1264 = vsyncpa [#allocation4], 1 }
 0x51a   :  { %1266 = vsyncpa [#allocation4 + $0x1], 1 }

</bundles_post_ra>
